<compile_context>
chip_gen: v7x
topology: tpu7x:2x2x1
jax: 0.10.0
libtpu: 0.0.40
codegen_flags: <defaults>
</compile_context>

<pallas_src>
import functools
import math

import jax
import jax.numpy as jnp
from jax import lax
from jax.experimental import pallas as pl
from jax.experimental.pallas import tpu as pltpu


def mha_kernel(q_ref, k_ref, v_ref,
               wq_ref, bq_ref, wk_ref, bk_ref, wv_ref, bv_ref,
               wo_ref, bo_ref,
               o_ref, *, heads, d_k):
    f32, bf16 = jnp.float32, jnp.bfloat16
    scale = 1.0 / math.sqrt(d_k)

    xq = q_ref[...].astype(bf16)      # (TQ, D)
    xk = k_ref[...].astype(bf16)      # (S,  D)
    xv = v_ref[...].astype(bf16)      # (S,  D)

    # Full-width projections: one lane-dense MXU matmul each (output N = d_model),
    # f32 accumulation, bias added once on the full tile.
    qp = jnp.dot(xq, wq_ref[...], preferred_element_type=f32) + bq_ref[...].astype(f32)
    kp = jnp.dot(xk, wk_ref[...], preferred_element_type=f32) + bk_ref[...].astype(f32)
    vp = jnp.dot(xv, wv_ref[...], preferred_element_type=f32) + bv_ref[...].astype(f32)

    # Fold 1/sqrt(d_k) into Q once (instead of scaling every per-head score tile);
    # cast once to bf16, then per-head work is pure slicing + matmuls.
    qb = (qp * scale).astype(bf16)    # (TQ, D)
    kb = kp.astype(bf16)              # (S,  D)
    vb = vp.astype(bf16)              # (S,  D)

    d_model = wo_ref.shape[1]
    acc = jnp.zeros((qb.shape[0], d_model), f32)   # fused out-projection accumulator

    for h in range(heads):            # static unrolled loop; heads is small & fixed
        lo, hi = h * d_k, (h + 1) * d_k
        qh = qb[:, lo:hi]             # (TQ, d_k) static lane slices of projected acts
        kh = kb[:, lo:hi]             # (S,  d_k)
        vh = vb[:, lo:hi]             # (S,  d_k)

        # Scores: contract the d_k axis directly (no materialized transpose).
        # NOTE: the reference attention() never applies the mask to the scores.
        s = lax.dot_general(qh, kh,
                            dimension_numbers=(((1,), (1,)), ((), ())),
                            preferred_element_type=f32)                 # (TQ, S)

        # Softmax over keys; EUP approx reciprocal for the denominator.
        s = s - jnp.max(s, axis=-1, keepdims=True)
        p = jnp.exp(s)
        p = p * pl.reciprocal(jnp.sum(p, axis=-1, keepdims=True), approx=True)

        # Head output in bf16, folded straight into the Wo projection (no concat).
        ho = jnp.dot(p.astype(bf16), vh, preferred_element_type=f32)    # (TQ, d_k)
        acc = acc + jnp.dot(ho.astype(bf16), wo_ref[lo:hi, :], preferred_element_type=f32)

    o_ref[...] = (acc + bo_ref[...].astype(f32)).astype(o_ref.dtype)


def multi_head_attention(q, k, v, params, mask=None, *, heads, q_tile=128):
    """q, k, v: (B, S, D) float32.  mask accepted but unused (matches reference)."""
    del mask  # reference attention() unsqueezes the mask but never applies it
    B, S, D = q.shape
    assert D % heads == 0, "d_model must divide evenly into heads"
    assert D % 128 == 0, "keep d_model a multiple of 128 lanes (pad if necessary)"
    d_k = D // heads

    tq = S if S <= q_tile else q_tile
    assert S % tq == 0, "sequence length must be divisible by the query tile"
    n_q = S // tq

    # Activations: batch dim squeezed; Q tiled over rows, K/V full per batch.
    q_spec = pl.BlockSpec((pl.Squeezed(), tq, D), lambda b, i: (b, i, 0))
    kv_spec = pl.BlockSpec((pl.Squeezed(), S, D), lambda b, i: (b, 0, 0))
    out_spec = pl.BlockSpec((pl.Squeezed(), tq, D), lambda b, i: (b, i, 0))
    # Grid-invariant weights/biases: whole array resident in VMEM, single-buffered.
    w_spec = pl.BlockSpec(memory_space=pltpu.MemorySpace.VMEM)

    weight_names = ["wq", "bq", "wk", "bk", "wv", "bv", "wo", "bo"]

    kernel = functools.partial(mha_kernel, heads=heads, d_k=d_k)

    # --- cost estimate (advisory, for XLA scheduling around the custom call) ---
    flops = B * (8 * S * D * D + 4 * S * S * D)        # projections + QK^T + PV + Wo
    transcendentals = B * heads * S * S                # exp in softmax
    bytes_accessed = 4 * 4 * B * S * D + 2 * (4 * D * D + 4 * D)

    # --- explicit VMEM budget: bf16 weights (single-buffered) + pipelined act tiles ---
    resident_w = 2 * (4 * D * D + 4 * D)                       # bf16 weights + biases
    act_bytes = 4 * 2 * (2 * tq * D + 2 * S * D)               # f32 q/out + k/v, 2x buffered
    scratch = 4 * (tq * S + 6 * tq * D + 4 * S * D)            # transient projections/temps
    vmem_limit = int(min(64 * 1024 * 1024,
                         max(resident_w + act_bytes + scratch + (4 << 20), 16 << 20)))

    return pl.pallas_call(
        kernel,
        out_shape=jax.ShapeDtypeStruct((B, S, D), jnp.float32),
        grid_spec=pltpu.PrefetchScalarGridSpec(
            num_scalar_prefetch=0,
            grid=(B, n_q),
            in_specs=[q_spec, kv_spec, kv_spec] + [w_spec] * len(weight_names),
            out_specs=out_spec,
        ),
        compiler_params=pltpu.CompilerParams(
            dimension_semantics=("parallel", "parallel"),
            vmem_limit_bytes=vmem_limit,
        ),
        cost_estimate=pl.CostEstimate(
            flops=int(flops),
            transcendentals=int(transcendentals),
            bytes_accessed=int(bytes_accessed)),
    )(q, k, v, *[params[n] for n in weight_names])


def make_params(key, d_model):
    """Deterministic synthetic parameters. Linear weights stored as (in, out), bf16."""
    ks = jax.random.split(key, 8)
    init = lambda kk, shape: (0.1 * jax.random.normal(kk, shape, jnp.float32)).astype(jnp.bfloat16)
    return {
        "wq": init(ks[0], (d_model, d_model)), "bq": init(ks[1], (1, d_model)),
        "wk": init(ks[2], (d_model, d_model)), "bk": init(ks[3], (1, d_model)),
        "wv": init(ks[4], (d_model, d_model)), "bv": init(ks[5], (1, d_model)),
        "wo": init(ks[6], (d_model, d_model)), "bo": init(ks[7], (1, d_model)),
    }


def mha_ref(q, k, v, params, *, heads):
    """Pure-JAX f32 reference (same bf16 parameter values, upcast to f32)."""
    B, S, D = q.shape
    d_k = D // heads
    f32 = jnp.float32
    wq, bq = params["wq"].astype(f32), params["bq"].astype(f32)
    wk, bk = params["wk"].astype(f32), params["bk"].astype(f32)
    wv, bv = params["wv"].astype(f32), params["bv"].astype(f32)
    wo, bo = params["wo"].astype(f32), params["bo"].astype(f32)

    qp = (q @ wq + bq).reshape(B, S, heads, d_k).transpose(0, 2, 1, 3)
    kp = (k @ wk + bk).reshape(B, S, heads, d_k).transpose(0, 2, 1, 3)
    vp = (v @ wv + bv).reshape(B, S, heads, d_k).transpose(0, 2, 1, 3)
    s = jnp.einsum("bhqd,bhkd->bhqk", qp, kp) / math.sqrt(d_k)
    p = jax.nn.softmax(s, axis=-1)                       # mask never applied (as in reference)
    o = jnp.einsum("bhqk,bhkd->bhqd", p, vp).transpose(0, 2, 1, 3).reshape(B, S, D)
    return o @ wo + bo


if __name__ == "__main__":
    B, S, D, H = 2, 16, 128, 4   # d_model kept at a lane-dense multiple of 128

    key = jax.random.PRNGKey(0)
    kq, kk, kv, kp = jax.random.split(key, 4)
    q = jax.random.normal(kq, (B, S, D), dtype=jnp.float32)
    k = jax.random.normal(kk, (B, S, D), dtype=jnp.float32)
    v = jax.random.normal(kv, (B, S, D), dtype=jnp.float32)
    mask = jnp.ones((B, S, S), dtype=jnp.float32)        # unused by the reference semantics
    params = make_params(kp, D)

    out = multi_head_attention(q, k, v, params, mask=mask, heads=H)
    out = jax.block_until_ready(out)

    ref = mha_ref(q, k, v, params, heads=H)
    assert out.shape == (B, S, D)
    max_err = float(jnp.max(jnp.abs(out - ref)))
    assert jnp.allclose(out, ref, atol=5e-2, rtol=5e-2), f"mismatch vs ref (max err {max_err})"

    print("KERNEL_OK")
</pallas_src>

<mosaic_0001>
module attributes {stable_mosaic.version = 11 : i64} {
  func.func @mha_kernel(%arg0: i32, %arg1: i32, %arg2: memref<1x16x128xf32, #tpu.memory_space<vmem>>, %arg3: memref<1x16x128xf32, #tpu.memory_space<vmem>>, %arg4: memref<1x16x128xf32, #tpu.memory_space<vmem>>, %arg5: memref<128x128xbf16, #tpu.memory_space<vmem>>, %arg6: memref<1x128xbf16, #tpu.memory_space<vmem>>, %arg7: memref<128x128xbf16, #tpu.memory_space<vmem>>, %arg8: memref<1x128xbf16, #tpu.memory_space<vmem>>, %arg9: memref<128x128xbf16, #tpu.memory_space<vmem>>, %arg10: memref<1x128xbf16, #tpu.memory_space<vmem>>, %arg11: memref<128x128xbf16, #tpu.memory_space<vmem>>, %arg12: memref<1x128xbf16, #tpu.memory_space<vmem>>, %arg13: memref<1x16x128xf32, #tpu.memory_space<vmem>>) attributes {dimension_semantics = [#tpu.dimension_semantics<parallel>, #tpu.dimension_semantics<parallel>], iteration_bounds = array<i64: 2, 1>, scalar_prefetch = 0 : i64, scratch_operands = 0 : i64, tpu.core_type = #tpu.core_type<tc>, window_params = [{transform_indices = @transform_0, window_bounds = array<i64: 1, 16, 128>}, {transform_indices = @transform_1, window_bounds = array<i64: 1, 16, 128>}, {transform_indices = @transform_2, window_bounds = array<i64: 1, 16, 128>}, {pipeline_mode = #tpu.pipeline_mode<synchronous>, transform_indices = @transform_3, window_bounds = array<i64: 128, 128>}, {pipeline_mode = #tpu.pipeline_mode<synchronous>, transform_indices = @transform_4, window_bounds = array<i64: 1, 128>}, {pipeline_mode = #tpu.pipeline_mode<synchronous>, transform_indices = @transform_5, window_bounds = array<i64: 128, 128>}, {pipeline_mode = #tpu.pipeline_mode<synchronous>, transform_indices = @transform_6, window_bounds = array<i64: 1, 128>}, {pipeline_mode = #tpu.pipeline_mode<synchronous>, transform_indices = @transform_7, window_bounds = array<i64: 128, 128>}, {pipeline_mode = #tpu.pipeline_mode<synchronous>, transform_indices = @transform_8, window_bounds = array<i64: 1, 128>}, {pipeline_mode = #tpu.pipeline_mode<synchronous>, transform_indices = @transform_9, window_bounds = array<i64: 128, 128>}, {pipeline_mode = #tpu.pipeline_mode<synchronous>, transform_indices = @transform_10, window_bounds = array<i64: 1, 128>}, {transform_indices = @transform_11, window_bounds = array<i64: 1, 16, 128>}]} {
    %c0 = arith.constant 0 : index
    %c0_0 = arith.constant 0 : index
    %c0_1 = arith.constant 0 : index
    %0 = vector.load %arg2[%c0, %c0_0, %c0_1] : memref<1x16x128xf32, #tpu.memory_space<vmem>>, vector<1x16x128xf32>
    %1 = vector.shape_cast %0 : vector<1x16x128xf32> to vector<16x128xf32>
    %2 = arith.truncf %1 : vector<16x128xf32> to vector<16x128xbf16>
    %c0_2 = arith.constant 0 : index
    %c0_3 = arith.constant 0 : index
    %c0_4 = arith.constant 0 : index
    %3 = vector.load %arg3[%c0_2, %c0_3, %c0_4] : memref<1x16x128xf32, #tpu.memory_space<vmem>>, vector<1x16x128xf32>
    %4 = vector.shape_cast %3 : vector<1x16x128xf32> to vector<16x128xf32>
    %5 = arith.truncf %4 : vector<16x128xf32> to vector<16x128xbf16>
    %c0_5 = arith.constant 0 : index
    %c0_6 = arith.constant 0 : index
    %c0_7 = arith.constant 0 : index
    %6 = vector.load %arg4[%c0_5, %c0_6, %c0_7] : memref<1x16x128xf32, #tpu.memory_space<vmem>>, vector<1x16x128xf32>
    %7 = vector.shape_cast %6 : vector<1x16x128xf32> to vector<16x128xf32>
    %8 = arith.truncf %7 : vector<16x128xf32> to vector<16x128xbf16>
    %c0_8 = arith.constant 0 : index
    %c0_9 = arith.constant 0 : index
    %9 = vector.load %arg5[%c0_8, %c0_9] : memref<128x128xbf16, #tpu.memory_space<vmem>>, vector<128x128xbf16>
    %cst = arith.constant dense<0.000000e+00> : vector<16x128xf32>
    %10 = tpu.matmul %2, %9, %cst {dimension_numbers = #tpu.dot_dimension_numbers<[1], [0], [0], [1], [0, 0, 1, 1], [], []>} : vector<16x128xbf16>, vector<128x128xbf16>, vector<16x128xf32> -> vector<16x128xf32>
    %c0_10 = arith.constant 0 : index
    %c0_11 = arith.constant 0 : index
    %11 = vector.load %arg6[%c0_10, %c0_11] : memref<1x128xbf16, #tpu.memory_space<vmem>>, vector<1x128xbf16>
    %12 = arith.extf %11 : vector<1x128xbf16> to vector<1x128xf32>
    %13 = vector.broadcast %12 : vector<1x128xf32> to vector<16x128xf32>
    %14 = arith.addf %10, %13 : vector<16x128xf32>
    %c0_12 = arith.constant 0 : index
    %c0_13 = arith.constant 0 : index
    %15 = vector.load %arg7[%c0_12, %c0_13] : memref<128x128xbf16, #tpu.memory_space<vmem>>, vector<128x128xbf16>
    %cst_14 = arith.constant dense<0.000000e+00> : vector<16x128xf32>
    %16 = tpu.matmul %5, %15, %cst_14 {dimension_numbers = #tpu.dot_dimension_numbers<[1], [0], [0], [1], [0, 0, 1, 1], [], []>} : vector<16x128xbf16>, vector<128x128xbf16>, vector<16x128xf32> -> vector<16x128xf32>
    %c0_15 = arith.constant 0 : index
    %c0_16 = arith.constant 0 : index
    %17 = vector.load %arg8[%c0_15, %c0_16] : memref<1x128xbf16, #tpu.memory_space<vmem>>, vector<1x128xbf16>
    %18 = arith.extf %17 : vector<1x128xbf16> to vector<1x128xf32>
    %19 = vector.broadcast %18 : vector<1x128xf32> to vector<16x128xf32>
    %20 = arith.addf %16, %19 : vector<16x128xf32>
    %c0_17 = arith.constant 0 : index
    %c0_18 = arith.constant 0 : index
    %21 = vector.load %arg9[%c0_17, %c0_18] : memref<128x128xbf16, #tpu.memory_space<vmem>>, vector<128x128xbf16>
    %cst_19 = arith.constant dense<0.000000e+00> : vector<16x128xf32>
    %22 = tpu.matmul %8, %21, %cst_19 {dimension_numbers = #tpu.dot_dimension_numbers<[1], [0], [0], [1], [0, 0, 1, 1], [], []>} : vector<16x128xbf16>, vector<128x128xbf16>, vector<16x128xf32> -> vector<16x128xf32>
    %c0_20 = arith.constant 0 : index
    %c0_21 = arith.constant 0 : index
    %23 = vector.load %arg10[%c0_20, %c0_21] : memref<1x128xbf16, #tpu.memory_space<vmem>>, vector<1x128xbf16>
    %24 = arith.extf %23 : vector<1x128xbf16> to vector<1x128xf32>
    %25 = vector.broadcast %24 : vector<1x128xf32> to vector<16x128xf32>
    %26 = arith.addf %22, %25 : vector<16x128xf32>
    %cst_22 = arith.constant 0.176776692 : f32
    %27 = vector.broadcast %cst_22 : f32 to vector<16x128xf32>
    %28 = arith.mulf %14, %27 : vector<16x128xf32>
    %29 = arith.truncf %28 : vector<16x128xf32> to vector<16x128xbf16>
    %30 = arith.truncf %20 : vector<16x128xf32> to vector<16x128xbf16>
    %31 = arith.truncf %26 : vector<16x128xf32> to vector<16x128xbf16>
    %cst_23 = arith.constant 0.000000e+00 : f32
    %32 = vector.broadcast %cst_23 : f32 to vector<16x128xf32>
    %33 = vector.extract_strided_slice %29 {offsets = [0, 0], sizes = [16, 32], strides = [1, 1]} : vector<16x128xbf16> to vector<16x32xbf16>
    %34 = vector.extract_strided_slice %30 {offsets = [0, 0], sizes = [16, 32], strides = [1, 1]} : vector<16x128xbf16> to vector<16x32xbf16>
    %35 = vector.extract_strided_slice %31 {offsets = [0, 0], sizes = [16, 32], strides = [1, 1]} : vector<16x128xbf16> to vector<16x32xbf16>
    %cst_24 = arith.constant dense<0.000000e+00> : vector<16x16xf32>
    %36 = tpu.matmul %33, %34, %cst_24 {dimension_numbers = #tpu.dot_dimension_numbers<[1], [1], [0], [0], [0, 0, 1, 0], [], []>} : vector<16x32xbf16>, vector<16x32xbf16>, vector<16x16xf32> -> vector<16x16xf32>
    %cst_25 = arith.constant dense<0xFF800000> : vector<16xf32>
    %37 = vector.multi_reduction <maximumf>, %36, %cst_25 [1] : vector<16x16xf32> to vector<16xf32>
    %38 = vector.shape_cast %37 : vector<16xf32> to vector<16x1xf32>
    %39 = vector.broadcast %38 : vector<16x1xf32> to vector<16x16xf32>
    %40 = arith.subf %36, %39 : vector<16x16xf32>
    %41 = math.exp %40 : vector<16x16xf32>
    %cst_26 = arith.constant dense<0.000000e+00> : vector<16xf32>
    %42 = vector.multi_reduction <add>, %41, %cst_26 [1] : vector<16x16xf32> to vector<16xf32>
    %43 = vector.shape_cast %42 : vector<16xf32> to vector<16x1xf32>
    %44 = tpu.reciprocal %43 {approx = true} : vector<16x1xf32> -> vector<16x1xf32>
    %45 = vector.broadcast %44 : vector<16x1xf32> to vector<16x16xf32>
    %46 = arith.mulf %41, %45 : vector<16x16xf32>
    %47 = arith.truncf %46 : vector<16x16xf32> to vector<16x16xbf16>
    %cst_27 = arith.constant dense<0.000000e+00> : vector<16x32xf32>
    %48 = tpu.matmul %47, %35, %cst_27 {dimension_numbers = #tpu.dot_dimension_numbers<[1], [0], [0], [1], [0, 0, 1, 1], [], []>} : vector<16x16xbf16>, vector<16x32xbf16>, vector<16x32xf32> -> vector<16x32xf32>
    %49 = arith.truncf %48 : vector<16x32xf32> to vector<16x32xbf16>
    %c0_28 = arith.constant 0 : index
    %c0_29 = arith.constant 0 : index
    %50 = vector.load %arg11[%c0_28, %c0_29] : memref<128x128xbf16, #tpu.memory_space<vmem>>, vector<32x128xbf16>
    %cst_30 = arith.constant dense<0.000000e+00> : vector<16x128xf32>
    %51 = tpu.matmul %49, %50, %cst_30 {dimension_numbers = #tpu.dot_dimension_numbers<[1], [0], [0], [1], [0, 0, 1, 1], [], []>} : vector<16x32xbf16>, vector<32x128xbf16>, vector<16x128xf32> -> vector<16x128xf32>
    %52 = arith.addf %32, %51 : vector<16x128xf32>
    %53 = vector.extract_strided_slice %29 {offsets = [0, 32], sizes = [16, 32], strides = [1, 1]} : vector<16x128xbf16> to vector<16x32xbf16>
    %54 = vector.extract_strided_slice %30 {offsets = [0, 32], sizes = [16, 32], strides = [1, 1]} : vector<16x128xbf16> to vector<16x32xbf16>
    %55 = vector.extract_strided_slice %31 {offsets = [0, 32], sizes = [16, 32], strides = [1, 1]} : vector<16x128xbf16> to vector<16x32xbf16>
    %cst_31 = arith.constant dense<0.000000e+00> : vector<16x16xf32>
    %56 = tpu.matmul %53, %54, %cst_31 {dimension_numbers = #tpu.dot_dimension_numbers<[1], [1], [0], [0], [0, 0, 1, 0], [], []>} : vector<16x32xbf16>, vector<16x32xbf16>, vector<16x16xf32> -> vector<16x16xf32>
    %cst_32 = arith.constant dense<0xFF800000> : vector<16xf32>
    %57 = vector.multi_reduction <maximumf>, %56, %cst_32 [1] : vector<16x16xf32> to vector<16xf32>
    %58 = vector.shape_cast %57 : vector<16xf32> to vector<16x1xf32>
    %59 = vector.broadcast %58 : vector<16x1xf32> to vector<16x16xf32>
    %60 = arith.subf %56, %59 : vector<16x16xf32>
    %61 = math.exp %60 : vector<16x16xf32>
    %cst_33 = arith.constant dense<0.000000e+00> : vector<16xf32>
    %62 = vector.multi_reduction <add>, %61, %cst_33 [1] : vector<16x16xf32> to vector<16xf32>
    %63 = vector.shape_cast %62 : vector<16xf32> to vector<16x1xf32>
    %64 = tpu.reciprocal %63 {approx = true} : vector<16x1xf32> -> vector<16x1xf32>
    %65 = vector.broadcast %64 : vector<16x1xf32> to vector<16x16xf32>
    %66 = arith.mulf %61, %65 : vector<16x16xf32>
    %67 = arith.truncf %66 : vector<16x16xf32> to vector<16x16xbf16>
    %cst_34 = arith.constant dense<0.000000e+00> : vector<16x32xf32>
    %68 = tpu.matmul %67, %55, %cst_34 {dimension_numbers = #tpu.dot_dimension_numbers<[1], [0], [0], [1], [0, 0, 1, 1], [], []>} : vector<16x16xbf16>, vector<16x32xbf16>, vector<16x32xf32> -> vector<16x32xf32>
    %69 = arith.truncf %68 : vector<16x32xf32> to vector<16x32xbf16>
    %c32 = arith.constant 32 : index
    %c0_35 = arith.constant 0 : index
    %70 = vector.load %arg11[%c32, %c0_35] : memref<128x128xbf16, #tpu.memory_space<vmem>>, vector<32x128xbf16>
    %cst_36 = arith.constant dense<0.000000e+00> : vector<16x128xf32>
    %71 = tpu.matmul %69, %70, %cst_36 {dimension_numbers = #tpu.dot_dimension_numbers<[1], [0], [0], [1], [0, 0, 1, 1], [], []>} : vector<16x32xbf16>, vector<32x128xbf16>, vector<16x128xf32> -> vector<16x128xf32>
    %72 = arith.addf %52, %71 : vector<16x128xf32>
    %73 = vector.extract_strided_slice %29 {offsets = [0, 64], sizes = [16, 32], strides = [1, 1]} : vector<16x128xbf16> to vector<16x32xbf16>
    %74 = vector.extract_strided_slice %30 {offsets = [0, 64], sizes = [16, 32], strides = [1, 1]} : vector<16x128xbf16> to vector<16x32xbf16>
    %75 = vector.extract_strided_slice %31 {offsets = [0, 64], sizes = [16, 32], strides = [1, 1]} : vector<16x128xbf16> to vector<16x32xbf16>
    %cst_37 = arith.constant dense<0.000000e+00> : vector<16x16xf32>
    %76 = tpu.matmul %73, %74, %cst_37 {dimension_numbers = #tpu.dot_dimension_numbers<[1], [1], [0], [0], [0, 0, 1, 0], [], []>} : vector<16x32xbf16>, vector<16x32xbf16>, vector<16x16xf32> -> vector<16x16xf32>
    %cst_38 = arith.constant dense<0xFF800000> : vector<16xf32>
    %77 = vector.multi_reduction <maximumf>, %76, %cst_38 [1] : vector<16x16xf32> to vector<16xf32>
    %78 = vector.shape_cast %77 : vector<16xf32> to vector<16x1xf32>
    %79 = vector.broadcast %78 : vector<16x1xf32> to vector<16x16xf32>
    %80 = arith.subf %76, %79 : vector<16x16xf32>
    %81 = math.exp %80 : vector<16x16xf32>
    %cst_39 = arith.constant dense<0.000000e+00> : vector<16xf32>
    %82 = vector.multi_reduction <add>, %81, %cst_39 [1] : vector<16x16xf32> to vector<16xf32>
    %83 = vector.shape_cast %82 : vector<16xf32> to vector<16x1xf32>
    %84 = tpu.reciprocal %83 {approx = true} : vector<16x1xf32> -> vector<16x1xf32>
    %85 = vector.broadcast %84 : vector<16x1xf32> to vector<16x16xf32>
    %86 = arith.mulf %81, %85 : vector<16x16xf32>
    %87 = arith.truncf %86 : vector<16x16xf32> to vector<16x16xbf16>
    %cst_40 = arith.constant dense<0.000000e+00> : vector<16x32xf32>
    %88 = tpu.matmul %87, %75, %cst_40 {dimension_numbers = #tpu.dot_dimension_numbers<[1], [0], [0], [1], [0, 0, 1, 1], [], []>} : vector<16x16xbf16>, vector<16x32xbf16>, vector<16x32xf32> -> vector<16x32xf32>
    %89 = arith.truncf %88 : vector<16x32xf32> to vector<16x32xbf16>
    %c64 = arith.constant 64 : index
    %c0_41 = arith.constant 0 : index
    %90 = vector.load %arg11[%c64, %c0_41] : memref<128x128xbf16, #tpu.memory_space<vmem>>, vector<32x128xbf16>
    %cst_42 = arith.constant dense<0.000000e+00> : vector<16x128xf32>
    %91 = tpu.matmul %89, %90, %cst_42 {dimension_numbers = #tpu.dot_dimension_numbers<[1], [0], [0], [1], [0, 0, 1, 1], [], []>} : vector<16x32xbf16>, vector<32x128xbf16>, vector<16x128xf32> -> vector<16x128xf32>
    %92 = arith.addf %72, %91 : vector<16x128xf32>
    %93 = vector.extract_strided_slice %29 {offsets = [0, 96], sizes = [16, 32], strides = [1, 1]} : vector<16x128xbf16> to vector<16x32xbf16>
    %94 = vector.extract_strided_slice %30 {offsets = [0, 96], sizes = [16, 32], strides = [1, 1]} : vector<16x128xbf16> to vector<16x32xbf16>
    %95 = vector.extract_strided_slice %31 {offsets = [0, 96], sizes = [16, 32], strides = [1, 1]} : vector<16x128xbf16> to vector<16x32xbf16>
    %cst_43 = arith.constant dense<0.000000e+00> : vector<16x16xf32>
    %96 = tpu.matmul %93, %94, %cst_43 {dimension_numbers = #tpu.dot_dimension_numbers<[1], [1], [0], [0], [0, 0, 1, 0], [], []>} : vector<16x32xbf16>, vector<16x32xbf16>, vector<16x16xf32> -> vector<16x16xf32>
    %cst_44 = arith.constant dense<0xFF800000> : vector<16xf32>
    %97 = vector.multi_reduction <maximumf>, %96, %cst_44 [1] : vector<16x16xf32> to vector<16xf32>
    %98 = vector.shape_cast %97 : vector<16xf32> to vector<16x1xf32>
    %99 = vector.broadcast %98 : vector<16x1xf32> to vector<16x16xf32>
    %100 = arith.subf %96, %99 : vector<16x16xf32>
    %101 = math.exp %100 : vector<16x16xf32>
    %cst_45 = arith.constant dense<0.000000e+00> : vector<16xf32>
    %102 = vector.multi_reduction <add>, %101, %cst_45 [1] : vector<16x16xf32> to vector<16xf32>
    %103 = vector.shape_cast %102 : vector<16xf32> to vector<16x1xf32>
    %104 = tpu.reciprocal %103 {approx = true} : vector<16x1xf32> -> vector<16x1xf32>
    %105 = vector.broadcast %104 : vector<16x1xf32> to vector<16x16xf32>
    %106 = arith.mulf %101, %105 : vector<16x16xf32>
    %107 = arith.truncf %106 : vector<16x16xf32> to vector<16x16xbf16>
    %cst_46 = arith.constant dense<0.000000e+00> : vector<16x32xf32>
    %108 = tpu.matmul %107, %95, %cst_46 {dimension_numbers = #tpu.dot_dimension_numbers<[1], [0], [0], [1], [0, 0, 1, 1], [], []>} : vector<16x16xbf16>, vector<16x32xbf16>, vector<16x32xf32> -> vector<16x32xf32>
    %109 = arith.truncf %108 : vector<16x32xf32> to vector<16x32xbf16>
    %c96 = arith.constant 96 : index
    %c0_47 = arith.constant 0 : index
    %110 = vector.load %arg11[%c96, %c0_47] : memref<128x128xbf16, #tpu.memory_space<vmem>>, vector<32x128xbf16>
    %cst_48 = arith.constant dense<0.000000e+00> : vector<16x128xf32>
    %111 = tpu.matmul %109, %110, %cst_48 {dimension_numbers = #tpu.dot_dimension_numbers<[1], [0], [0], [1], [0, 0, 1, 1], [], []>} : vector<16x32xbf16>, vector<32x128xbf16>, vector<16x128xf32> -> vector<16x128xf32>
    %112 = arith.addf %92, %111 : vector<16x128xf32>
    %c0_49 = arith.constant 0 : index
    %c0_50 = arith.constant 0 : index
    %113 = vector.load %arg12[%c0_49, %c0_50] : memref<1x128xbf16, #tpu.memory_space<vmem>>, vector<1x128xbf16>
    %114 = arith.extf %113 : vector<1x128xbf16> to vector<1x128xf32>
    %115 = vector.broadcast %114 : vector<1x128xf32> to vector<16x128xf32>
    %116 = arith.addf %112, %115 : vector<16x128xf32>
    %c0_51 = arith.constant 0 : index
    %c0_52 = arith.constant 0 : index
    %c0_53 = arith.constant 0 : index
    %117 = vector.load %arg13[%c0_51, %c0_52, %c0_53] : memref<1x16x128xf32, #tpu.memory_space<vmem>>, vector<1x16x128xf32>
    %118 = vector.shape_cast %117 : vector<1x16x128xf32> to vector<16x128xf32>
    %119 = vector.shape_cast %116 : vector<16x128xf32> to vector<1x16x128xf32>
    tpu.vector_store %arg13[%c0_51, %c0_52, %c0_53], %119 {strides = array<i32>} : memref<1x16x128xf32, #tpu.memory_space<vmem>>, vector<1x16x128xf32>,
    return
  }
  func.func @transform_0(%arg0: i32, %arg1: i32) -> (i32, i32, i32) {
    %c0_i32 = arith.constant 0 : i32
    %c0_i32_0 = arith.constant 0 : i32
    return %arg0, %arg1, %c0_i32 : i32, i32, i32
  }
  func.func @transform_1(%arg0: i32, %arg1: i32) -> (i32, i32, i32) {
    %c0_i32 = arith.constant 0 : i32
    %c0_i32_0 = arith.constant 0 : i32
    %c0_i32_1 = arith.constant 0 : i32
    return %arg0, %c0_i32, %c0_i32_0 : i32, i32, i32
  }
  func.func @transform_2(%arg0: i32, %arg1: i32) -> (i32, i32, i32) {
    %c0_i32 = arith.constant 0 : i32
    %c0_i32_0 = arith.constant 0 : i32
    %c0_i32_1 = arith.constant 0 : i32
    return %arg0, %c0_i32, %c0_i32_0 : i32, i32, i32
  }
  func.func @transform_3(%arg0: i32, %arg1: i32) -> (i32, i32) {
    %c0_i32 = arith.constant 0 : i32
    %c0_i32_0 = arith.constant 0 : i32
    %c0_i32_1 = arith.constant 0 : i32
    return %c0_i32, %c0_i32_0 : i32, i32
  }
  func.func @transform_4(%arg0: i32, %arg1: i32) -> (i32, i32) {
    %c0_i32 = arith.constant 0 : i32
    %c0_i32_0 = arith.constant 0 : i32
    %c0_i32_1 = arith.constant 0 : i32
    return %c0_i32, %c0_i32_0 : i32, i32
  }
  func.func @transform_5(%arg0: i32, %arg1: i32) -> (i32, i32) {
    %c0_i32 = arith.constant 0 : i32
    %c0_i32_0 = arith.constant 0 : i32
    %c0_i32_1 = arith.constant 0 : i32
    return %c0_i32, %c0_i32_0 : i32, i32
  }
  func.func @transform_6(%arg0: i32, %arg1: i32) -> (i32, i32) {
    %c0_i32 = arith.constant 0 : i32
    %c0_i32_0 = arith.constant 0 : i32
    %c0_i32_1 = arith.constant 0 : i32
    return %c0_i32, %c0_i32_0 : i32, i32
  }
  func.func @transform_7(%arg0: i32, %arg1: i32) -> (i32, i32) {
    %c0_i32 = arith.constant 0 : i32
    %c0_i32_0 = arith.constant 0 : i32
    %c0_i32_1 = arith.constant 0 : i32
    return %c0_i32, %c0_i32_0 : i32, i32
  }
  func.func @transform_8(%arg0: i32, %arg1: i32) -> (i32, i32) {
    %c0_i32 = arith.constant 0 : i32
    %c0_i32_0 = arith.constant 0 : i32
    %c0_i32_1 = arith.constant 0 : i32
    return %c0_i32, %c0_i32_0 : i32, i32
  }
  func.func @transform_9(%arg0: i32, %arg1: i32) -> (i32, i32) {
    %c0_i32 = arith.constant 0 : i32
    %c0_i32_0 = arith.constant 0 : i32
    %c0_i32_1 = arith.constant 0 : i32
    return %c0_i32, %c0_i32_0 : i32, i32
  }
  func.func @transform_10(%arg0: i32, %arg1: i32) -> (i32, i32) {
    %c0_i32 = arith.constant 0 : i32
    %c0_i32_0 = arith.constant 0 : i32
    %c0_i32_1 = arith.constant 0 : i32
    return %c0_i32, %c0_i32_0 : i32, i32
  }
  func.func @transform_11(%arg0: i32, %arg1: i32) -> (i32, i32, i32) {
    %c0_i32 = arith.constant 0 : i32
    %c0_i32_0 = arith.constant 0 : i32
    return %arg0, %arg1, %c0_i32 : i32, i32, i32
  }
}

</mosaic_0001>

<bundles_post_ra>
// kernel: tpu_custom_call.1
= control target key start
LH: loop header
LB: loop body
LE: loop exit
PB: predicated region body
PF: predicated region fallthrough
CT: control target
= control target key end

     0   :  { %s3234_s0 = inlined_call_operand.hbm [shape: f32[2,16,128], index: 0, kind: input, shape index: {}]   ;;  %s3235_s1 = inlined_call_operand.hbm [shape: f32[2,16,128], index: 1, kind: input, shape index: {}]   ;;  %s3236_s2 = inlined_call_operand.hbm [shape: f32[2,16,128], index: 2, kind: input, shape index: {}]   ;;  %s3237_s3 = inlined_call_operand.hbm [shape: bf16[128,128], index: 3, kind: input, shape index: {}]   ;;  %s3238_s4 = inlined_call_operand.vmem [shape: bf16[1,128], index: 4, kind: input, shape index: {}]   ;;  %s3239_s5 = inlined_call_operand.hbm [shape: bf16[128,128], index: 5, kind: input, shape index: {}]   ;;  %s3240_s6 = inlined_call_operand.vmem [shape: bf16[1,128], index: 6, kind: input, shape index: {}]   ;;  %s3241_s7 = inlined_call_operand.hbm [shape: bf16[128,128], index: 7, kind: input, shape index: {}]   ;;  %s3242_s8 = inlined_call_operand.vmem [shape: bf16[1,128], index: 8, kind: input, shape index: {}]   ;;  %s3243_s9 = inlined_call_operand.hbm [shape: bf16[128,128], index: 9, kind: input, shape index: {}]   ;;  %s3244_s10 = inlined_call_operand.vmem [shape: bf16[1,128], index: 10, kind: input, shape index: {}]   ;;  %s3245_s11 = inlined_call_operand.hbm [shape: f32[2,16,128], index: 11, kind: output, shape index: {}]  }
   0x1   :  { %3272 = sst [smem:[#allocation28_spill]] %s3235_s1 }
   0x2   :  { %3273 = sst [smem:[#allocation29_spill]] %s3237_s3 }
   0x3   :  { %3274 = sst [smem:[#allocation30_spill]] %s3238_s4 }
   0x4   :  { %3275 = sst [smem:[#allocation31_spill]] %s3240_s6 }
   0x5   :  { %3276 = sst [smem:[#allocation32_spill]] %s3241_s7 }
   0x6   :  { %3277 = sst [smem:[#allocation33_spill]] %s3242_s8 }
   0x7   :  { %3278 = sst [smem:[#allocation34_spill]] %s3244_s10 }
   0x8   :  { %3279 = sst [smem:[#allocation35_spill]] %s3245_s11 }
   0x9   :  { %16 = vsyncpa [#allocation3], 0 }
   0xa   :  { %18 = vsyncpa [#allocation3 + $0x1], 0 }
   0xb   :  { %19 = vsyncpa [#allocation6], 0 }
   0xc   :  { %21 = vsyncpa [#allocation6 + $0x1], 0 }
   0xd   :  { %22 = vsyncpa [#allocation9], 0 }
   0xe   :  { %23 = vsyncpa [#allocation12], 0 }
   0xf   :  { %24 = vsyncpa [#allocation4], 0 }
  0x10   :  { %26 = vsyncpa [#allocation4 + $0x1], 0  ;;  %s2671_s17 = smov 0   ;;  %s2673_s18 = smov 0  }
  0x11   :  { %s2675_s19 = smov 0   ;;  %s2677_s20 = smov 0  }
  0x12   :  { %s2679_s21 = smov 0   ;;  %s2681_s22 = smov 0  }
  0x13 LB: > { %3280 = sst [smem:[#allocation20_spill]] %s2570_s17  ;;  %s2702_s23 = sadd.s32 4294967295, %s2590_s22   ;;  %s2590_s22 = sphi %s2681_s22, %s32_s22   ;;  %s2586_s21 = sphi %s2679_s21, %s3328_s21   ;;  %s2582_s20 = sphi %s2677_s20, %s3327_s20   ;;  %s2578_s19 = sphi %s2675_s19, %s3331_s19   ;;  %s2574_s18 = sphi %s2673_s18, %s3330_s18   ;;  %s2570_s17 = sphi %s2671_s17, %s3329_s17  }
  0x14   : > { %3281 = sst [smem:[#allocation21_spill]] %s2582_s20  ;;  %s1833_s24 = sadd.s32 4294967294, %s2590_s22  }
  0x15   : > { %3282 = sst [smem:[#allocation22_spill]] %s2586_s21  ;;  %p66_p0 = scmp.ne.s32.totalorder %s2574_s18, %s2570_s17 }
  0x16   : > { %3283 = sst [smem:[#allocation23_spill]] %s2590_s22  ;;  %p3248_p1 = scmp.eq.s32.totalorder %s2702_s23, 0 }
  0x17   : > { %p318_p3 = scmp.eq.s32.totalorder %s1833_s24, 1  ;;  %p1834_p5 = scmp.ge.s32.totalorder %s2590_s22, 1 }
  0x18   : > { %p2711_p4 = por %p3248_p1, %p66_p0  ;;  %p325_p7 = scmp.lt.s32.totalorder %s2590_s22, 3 }
  0x19   : > { %p2716_p6 = por %p318_p3, %p66_p0  ;;  %s2592_s28 = smov [#allocation8]  }
  0x1a   : > { %s3284_s25 = scalar_select %p2711_p4, 1, 0 }
  0x1b   : > { %s3285_s26 = scalar_select %p2716_p6, 1, 0 }
  0x1c   : > { %p2721_p8 = pnand %p1834_p5, %p325_p7  ;;  %s337_s29 = sshll.u32 %s2592_s28, 4  ;;  %s2725_s29 = int_to_ptr.vmem [resolvable:$true] %s337_s29 }
  0x1d   : > { %3286 = sst [smem:[#allocation24_spill]] %s3285_s26  ;;  %s2593_s12 = smov [#allocation11]  }
  0x1e   : > { %s3287_s27 = scalar_select %p2721_p8, 1, 0 }
  0x1f   : > { %p2130_p9 = pneg %p2721_p8  ;;  %s369_s13 = sshll.u32 %s2593_s12, 4  ;;  %s2736_s13 = int_to_ptr.vmem [resolvable:$true] %s369_s13 }
  0x20   : > { %s3289_s3 = sld [smem:[#allocation29_spill]] }
  0x21   : > { %p2732_p11 = pnand %p2130_p9, %p3248_p1 }
  0x23   : > { %s3288_s30 = scalar_select %p2732_p11, 1, 0 }
  0x24   : > { %p2746_p13 = pneg %p2732_p11 }
  0x26   : > { %s2294_s16 = scalar_lea.hbm %s3289_s3, 1024 }
  0x27   : > { %p2295_p12 = scmp.ne.s32.totalorder %s3289_s3, %s2294_s16  ;;  %p2301_p5 = scmp.lt.u32.totalorder %s2294_s16, %s3289_s3 }
  0x28   : > { %s3290_s26 = scalar_select %p2746_p13, 1, 0 }
  0x29   : > { %p2297_p0 = pnand %p2746_p13, %p2295_p12 }
  0x2b   : > { %p2298_p3 = pneg %p2297_p0 }
  0x2d   : > { %p2303_p7 = pnand %p2301_p5, %p2298_p3 }
  0x2f   : > { %2306 = shalt.err (!%p2303_p7)
}
  0x30   : > { %s2307_s14 = scalar_lea.vmem %s2725_s29, 1024  ;;  %p2315_p2 = scmp.lt.s32.totalorder %s2725_s29, %s2725_s29 }
  0x31   : > { %p2308_p9 = scmp.ne.s32.totalorder %s2725_s29, %s2307_s14  ;;  %p2316_p6 = scmp.lt.s32.totalorder %s2307_s14, %s2307_s14 }
  0x33   : > { %p2310_p10 = pnand %p2308_p9, %p2746_p13  ;;  %p2317_p12 = por %p2316_p6, %p2315_p2 }
  0x35   : > { %p2311_p1 = pneg %p2310_p10 }
  0x37   : > { %p2318_p0 = pnand %p2317_p12, %p2311_p1 }
  0x39   : > { %2321 = shalt.err (!%p2318_p0)
}
  0x3a   : > { %s3250_s15 = smov 64   ;;  %s3252_s17 = smov 4  }
  0x3b   : > { %2133 = dma.hbm_to_vmem [thread:$0]  (!%p2732_p11), %s3289_s3, 1024, %s2725_s29, [#allocation9], %s3250_s15, %s3250_s15, %s3252_s17  }
  0x3c   : > { %s3291_s7 = sld [smem:[#allocation32_spill]] }
  0x42   : > { %s2322_s14 = scalar_lea.hbm %s3291_s7, 1024 }
  0x43   : > { %p2323_p1 = scmp.ne.s32.totalorder %s3291_s7, %s2322_s14  ;;  %p2329_p10 = scmp.lt.u32.totalorder %s2322_s14, %s3291_s7 }
  0x45   : > { %p2325_p2 = pnand %p2323_p1, %p2746_p13 }
  0x47   : > { %p2326_p6 = pneg %p2325_p2 }
  0x49   : > { %p2331_p3 = pnand %p2329_p10, %p2326_p6 }
  0x4b   : > { %2334 = shalt.err (!%p2331_p3)
}
  0x4c   : > { %s2335_s29 = scalar_lea.vmem %s2736_s13, 1024  ;;  %p2343_p12 = scmp.lt.s32.totalorder %s2736_s13, %s2736_s13 }
  0x4d   : > { %p2336_p5 = scmp.ne.s32.totalorder %s2736_s13, %s2335_s29  ;;  %p2344_p0 = scmp.lt.s32.totalorder %s2335_s29, %s2335_s29 }
  0x4f   : > { %p2338_p7 = pnand %p2336_p5, %p2746_p13  ;;  %p2345_p1 = por %p2344_p0, %p2343_p12 }
  0x51   : > { %p2339_p9 = pneg %p2338_p7 }
  0x53   : > { %p2346_p2 = pnand %p2345_p1, %p2339_p9 }
  0x55   : > { %2349 = shalt.err (!%p2346_p2)
}
  0x56   : > { %2139 = dma.hbm_to_vmem [thread:$0]  (!%p2732_p11), %s3291_s7, 1024, %s2736_s13, [#allocation12], %s3250_s15, %s3250_s15, %s3252_s17  }
  0x57   : > { %s44_s11 = sadd.s32 1, %s2586_s21  ;;  %s53_s20 = sadd.s32 1, %s2578_s19 }
  0x58   : > { %p46_p6 = scmp.ge.s32.totalorder %s44_s11, 2  ;;  %p60_p10 = scmp.ne.s32.totalorder %s2578_s19, %s2574_s18 }
  0x59   : > { %p61_p3 = scmp.eq.s32.totalorder %s2590_s22, 0  ;;  %p2161_p5 = scmp.lt.s32.totalorder %s2590_s22, 2 }
  0x5a   : > { %s3333_s11 = smov (%p46_p6, %s44_s11), 0  ;;  %p3293_p9 = scmp.eq.s32.totalorder %s2702_s23, 1 }
  0x5b   : > { %3292 = sst [smem:[#allocation25_spill]] %s3333_s11  ;;  %p62_p7 = por %p61_p3, %p60_p10 }
  0x5c   : > { %p2806_p12 = por %p3293_p9, %p60_p10  ;;  %s48_s24 = ssub.s32 %s2586_s21, %s3333_s11 }
  0x5d   : > { %s3254_s28 = sand.u32 1, %s2578_s19   ;;  %p51_p0 = scmp.eq.s32.totalorder %s48_s24, 0 }
  0x5e   : > { %s3294_s16 = scalar_select %p2806_p12, 1, 0 }
  0x5f   : > { %s2815_s13 = sshll.u32 %s3254_s28, 4  ;;  %s2818_s12 = sshll.u32 %s2586_s21, 8 }
  0x60   : > { %3295 = sst [smem:[#allocation26_spill]] %s3294_s16  ;;  %p2820_p1 = pnand %p2161_p5, %p62_p7 }
  0x61   : > { %s2825_s29 = scalar_select %p51_p0, %s2578_s19, %s53_s20  }
  0x62   : > { %s3296_s14 = scalar_select %p2820_p1, 1, 0 }
  0x63   : > { %3297 = sst [smem:[#allocation27_spill]] %s2825_s29  ;;  %s425_s8 = sand.u32 1, %s2590_s22  }
  0x64   : > { %s3298_s1 = sld [smem:[#allocation28_spill]]  ;;  %s429_s24 = scalar_lea.vmem [#allocation5], %s2815_s13 }
  0x65   : > { %s436_s28 = sshll.u32 %s429_s24, 4  ;;  %s2837_s3 = scalar_lea.sflag [#allocation6], %s425_s8  ;;  %s2835_s28 = int_to_ptr.vmem [resolvable:$true] %s436_s28 }
  0x66   : > { %p2843_p6 = pneg %p2820_p1 }
  0x68   : > { %s3299_s20 = scalar_select %p2843_p6, 1, 0 }
  0x6a   : > { %s2832_s17 = scalar_lea.hbm %s3298_s1, %s2818_s12  ;;  %s2355_s11 = scalar_lea.hbm %s3298_s1, 512 }
  0x6b   : > { %s2350_s7 = scalar_lea.hbm %s2832_s17, 256  ;;  %p2356_p5 = scmp.lt.u32.totalorder %s2832_s17, %s3298_s1 }
  0x6c   : > { %p2351_p2 = scmp.ne.s32.totalorder %s2832_s17, %s2350_s7  ;;  %p2357_p7 = scmp.lt.u32.totalorder %s2355_s11, %s2350_s7 }
  0x6d   : > { %p2359_p0 = scmp.lt.u32.totalorder %s2350_s7, %s2832_s17 }
  0x6e   : > { %p2353_p10 = pnand %p2843_p6, %p2351_p2  ;;  %p2358_p9 = por %p2357_p7, %p2356_p5 }
  0x70   : > { %p2354_p3 = pneg %p2353_p10  ;;  %p2360_p12 = por %p2359_p0, %p2358_p9 }
  0x72   : > { %p2361_p4 = pnand %p2360_p12, %p2354_p3 }
  0x74   : > { %2364 = shalt.err (!%p2361_p4)
}
  0x75   : > { %s2365_s8 = scalar_lea.vmem %s2835_s28, 256  ;;  %s2596_s15 = smov [#allocation5]  }
  0x76   : > { %p2366_p2 = scmp.ne.s32.totalorder %s2835_s28, %s2365_s8  ;;  %s2370_s10 = sshll.u32 %s2596_s15, 4  ;;  %s2371_s10 = int_to_ptr.vmem [resolvable:$false] %s2370_s10 }
  0x77   : > { %s2372_s21 = scalar_lea.vmem %s2371_s10, 512  ;;  %p2373_p11 = scmp.lt.s32.totalorder %s2835_s28, %s2371_s10 }
  0x78   : > { %p2368_p10 = pnand %p2366_p2, %p2843_p6  ;;  %p2374_p13 = scmp.lt.s32.totalorder %s2372_s21, %s2365_s8 }
  0x7a   : > { %p2369_p8 = pneg %p2368_p10  ;;  %p2375_p5 = por %p2374_p13, %p2373_p11 }
  0x7c   : > { %p2376_p7 = pnand %p2375_p5, %p2369_p8 }
  0x7e   : > { %2379 = shalt.err (!%p2376_p7)
}
  0x7f   : > { %s2597_s7 = smov 128   ;;  %s2598_s11 = smov 8  }
  0x80   : > { %2149 = dma.hbm_to_vmem [thread:$0]  (!%p2820_p1), %s2832_s17, 256, %s2835_s28, %s2837_s3, %s2597_s7, %s2597_s7, %s2598_s11  }
  0x81   : > { %s2599_s24 = smov [#allocation10]   ;;  %s2600_s10 = smov [#allocation13]  }
  0x82   : > { %s353_s15 = sshll.u32 %s2599_s24, 4  ;;  %s385_s8 = sshll.u32 %s2600_s10, 4  ;;  %s354_s15 = int_to_ptr.vmem [resolvable:$true] %s353_s15  ;;  %s386_s8 = int_to_ptr.vmem [resolvable:$true] %s385_s8 }
  0x83   : > { %s2380_s29 = scalar_lea.hbm %s3239_s5, 1024  ;;  %p3300_p8 = scmp.ne.s32.totalorder %s3290_s26, 0 }
  0x84   : > { %p2381_p4 = scmp.ne.s32.totalorder %s3239_s5, %s2380_s29  ;;  %p2387_p12 = scmp.lt.u32.totalorder %s2380_s29, %s3239_s5 }
  0x86   : > { %p2383_p11 = pnand %p2381_p4, %p3300_p8 }
  0x88   : > { %p2384_p13 = pneg %p2383_p11 }
  0x8a   : > { %p2389_p3 = pnand %p2387_p12, %p2384_p13 }
  0x8c   : > { %2392 = shalt.err (!%p2389_p3)
}
  0x8d   : > { %s2393_s17 = scalar_lea.vmem %s354_s15, 1024  ;;  %p2401_p10 = scmp.lt.s32.totalorder %s354_s15, %s354_s15 }
  0x8e   : > { %p2394_p9 = scmp.ne.s32.totalorder %s354_s15, %s2393_s17  ;;  %p2402_p5 = scmp.lt.s32.totalorder %s2393_s17, %s2393_s17 }
  0x90   : > { %p2396_p0 = pnand %p2394_p9, %p3300_p8  ;;  %p2403_p7 = por %p2402_p5, %p2401_p10 }
  0x92   : > { %p2397_p2 = pneg %p2396_p0 }
  0x94   : > { %p2404_p1 = pnand %p2403_p7, %p2397_p2 }
  0x96   : > { %2407 = shalt.err (!%p2404_p1)
}
  0x97   : > { %p3301_p4 = scmp.ne.s32.totalorder %s3288_s30, 0  ;;  %s3302_s1 = smov 4  }
  0x98   : > { %s3303_s22 = smov 64   ;;  %s2408_s29 = scalar_lea.hbm %s3243_s9, 1024 }
  0x99   : > { %2136 = dma.hbm_to_vmem [thread:$0]  (!%p3301_p4), %s3239_s5, 1024, %s354_s15, [#allocation9], %s3303_s22, %s3303_s22, %s3302_s1  }
  0x9a   : > { %p2409_p11 = scmp.ne.s32.totalorder %s3243_s9, %s2408_s29  ;;  %p2415_p12 = scmp.lt.u32.totalorder %s2408_s29, %s3243_s9 }
  0x9c   : > { %p2411_p1 = pnand %p2409_p11, %p3300_p8 }
  0x9e   : > { %p2412_p13 = pneg %p2411_p1 }
  0xa0   : > { %p2417_p3 = pnand %p2415_p12, %p2412_p13 }
  0xa2   : > { %2420 = shalt.err (!%p2417_p3)
}
  0xa3   : > { %s2421_s4 = scalar_lea.vmem %s386_s8, 1024  ;;  %p2429_p10 = scmp.lt.s32.totalorder %s386_s8, %s386_s8 }
  0xa4   : > { %p2422_p9 = scmp.ne.s32.totalorder %s386_s8, %s2421_s4  ;;  %p2430_p5 = scmp.lt.s32.totalorder %s2421_s4, %s2421_s4 }
  0xa6   : > { %p2424_p0 = pnand %p2422_p9, %p3300_p8  ;;  %p2431_p7 = por %p2430_p5, %p2429_p10 }
  0xa8   : > { %p2425_p2 = pneg %p2424_p0 }
  0xaa   : > { %p2432_p6 = pnand %p2431_p7, %p2425_p2 }
  0xac   : > { %2435 = shalt.err (!%p2432_p6)
}
  0xad   : > { %2142 = dma.hbm_to_vmem [thread:$0]  (!%p3301_p4), %s3243_s9, 1024, %s386_s8, [#allocation12], %s3303_s22, %s3303_s22, %s3302_s1  }
  0xae   : > { %s2916_s28 = scalar_lea.hbm %s3234_s0, %s2818_s12  ;;  %s406_s30 = scalar_lea.vmem [#allocation2], %s2815_s13 }
  0xaf   : > { %s415_s29 = sshll.u32 %s406_s30, 4  ;;  %s2925_s21 = scalar_lea.hbm %s3236_s2, %s2818_s12  ;;  %s2919_s29 = int_to_ptr.vmem [resolvable:$true] %s415_s29 }
  0xb0   : > { %s3304_s17 = sand.u32 1, %s2578_s19   ;;  %s2436_s1 = scalar_lea.hbm %s2916_s28, 256 }
  0xb1   : > { %s2929_s8 = scalar_lea.sflag [#allocation3], %s3304_s17  ;;  %p2437_p6 = scmp.ne.s32.totalorder %s2916_s28, %s2436_s1 }
  0xb2   : > { %p3305_p8 = scmp.ne.s32.totalorder %s3299_s20, 0  ;;  %s2441_s15 = scalar_lea.hbm %s3234_s0, 512 }
  0xb3   : > { %p2442_p1 = scmp.lt.u32.totalorder %s2916_s28, %s3234_s0  ;;  %p2443_p13 = scmp.lt.u32.totalorder %s2441_s15, %s2436_s1 }
  0xb4   : > { %p2439_p4 = pnand %p2437_p6, %p3305_p8  ;;  %p2445_p3 = scmp.lt.u32.totalorder %s2436_s1, %s2916_s28 }
  0xb5   : > { %p2444_p12 = por %p2443_p13, %p2442_p1 }
  0xb6   : > { %p2440_p11 = pneg %p2439_p4 }
  0xb7   : > { %p2446_p9 = por %p2445_p3, %p2444_p12 }
  0xb9   : > { %p2447_p0 = pnand %p2446_p9, %p2440_p11 }
  0xbb   : > { %2450 = shalt.err (!%p2447_p0)
}
  0xbc   : > { %s2451_s12 = scalar_lea.vmem %s2919_s29, 256  ;;  %s2601_s16 = smov [#allocation2]  }
  0xbd   : > { %p2452_p2 = scmp.ne.s32.totalorder %s2919_s29, %s2451_s12  ;;  %s2456_s30 = sshll.u32 %s2601_s16, 4  ;;  %s2457_s30 = int_to_ptr.vmem [resolvable:$false] %s2456_s30 }
  0xbe   : > { %s2458_s24 = scalar_lea.vmem %s2457_s30, 512  ;;  %p2459_p7 = scmp.lt.s32.totalorder %s2919_s29, %s2457_s30 }
  0xbf   : > { %p2454_p10 = pnand %p2452_p2, %p3305_p8  ;;  %p2460_p6 = scmp.lt.s32.totalorder %s2458_s24, %s2451_s12 }
  0xc1   : > { %p2455_p5 = pneg %p2454_p10  ;;  %p2461_p4 = por %p2460_p6, %p2459_p7 }
  0xc3   : > { %p2462_p1 = pnand %p2461_p4, %p2455_p5 }
  0xc5   : > { %2465 = shalt.err (!%p2462_p1)
}
  0xc6   : > { %p3306_p11 = scmp.ne.s32.totalorder %s3296_s14, 0  ;;  %s450_s10 = scalar_lea.vmem [#allocation7], %s2815_s13 }
  0xc7   : > { %s457_s17 = sshll.u32 %s450_s10, 4  ;;  %s2466_s1 = scalar_lea.hbm %s2925_s21, 256  ;;  %s2957_s17 = int_to_ptr.vmem [resolvable:$true] %s457_s17 }
  0xc8   : > { %2146 = dma.hbm_to_vmem [thread:$0]  (!%p3306_p11), %s2916_s28, 256, %s2919_s29, %s2929_s8, %s2597_s7, %s2597_s7, %s2598_s11  }
  0xc9   : > { %p2467_p13 = scmp.ne.s32.totalorder %s2925_s21, %s2466_s1  ;;  %s2471_s15 = scalar_lea.hbm %s3236_s2, 512 }
  0xca   : > { %p2472_p9 = scmp.lt.u32.totalorder %s2925_s21, %s3236_s2  ;;  %p2473_p0 = scmp.lt.u32.totalorder %s2471_s15, %s2466_s1 }
  0xcb   : > { %p2469_p12 = pnand %p2467_p13, %p3305_p8  ;;  %p2475_p10 = scmp.lt.u32.totalorder %s2466_s1, %s2925_s21 }
  0xcc   : > { %p2474_p2 = por %p2473_p0, %p2472_p9 }
  0xcd   : > { %p2470_p3 = pneg %p2469_p12 }
  0xce   : > { %p2476_p5 = por %p2475_p10, %p2474_p2 }
  0xd0   : > { %p2477_p7 = pnand %p2476_p5, %p2470_p3 }
  0xd2   : > { %2480 = shalt.err (!%p2477_p7)
}
  0xd3   : > { %s2481_s13 = scalar_lea.vmem %s2957_s17, 256  ;;  %s2602_s28 = smov [#allocation7]  }
  0xd4   : > { %p2482_p6 = scmp.ne.s32.totalorder %s2957_s17, %s2481_s13  ;;  %s2486_s29 = sshll.u32 %s2602_s28, 4  ;;  %s2487_s29 = int_to_ptr.vmem [resolvable:$false] %s2486_s29 }
  0xd5   : > { %s2488_s8 = scalar_lea.vmem %s2487_s29, 512  ;;  %p2489_p13 = scmp.lt.s32.totalorder %s2957_s17, %s2487_s29 }
  0xd6   : > { %p2484_p4 = pnand %p2482_p6, %p3305_p8  ;;  %p2490_p12 = scmp.lt.s32.totalorder %s2488_s8, %s2481_s13 }
  0xd8   : > { %p2485_p1 = pneg %p2484_p4  ;;  %p2491_p9 = por %p2490_p12, %p2489_p13 }
  0xda   : > { %p2492_p0 = pnand %p2491_p9, %p2485_p1 }
  0xdc   : > { %2495 = shalt.err (!%p2492_p0)
}
  0xdd   : > { %2152 = dma.hbm_to_vmem [thread:$0]  (!%p3306_p11), %s2925_s21, 256, %s2957_s17, %s2837_s3, %s2597_s7, %s2597_s7, %s2598_s11  }
  0xde   : > { %p3307_p8 = scmp.ne.s32.totalorder %s3287_s27, 0 }
  0xdf   : > { %s2987_s20 = sand.u32 (!%p3307_p8), 1, %s2574_s18   ;;  %p3308_p3 = scmp.ne.s32.totalorder (!%p3307_p8), %s3284_s25, 0 }
  0xe0   : > { %469 = sbr.rel (%p3307_p8) target bundleno = 3315 (0xcf3), region = 64  ;;  %s2990_s12 = sshll.u32 (!%p3307_p8), %s2987_s20, 4 }
  0xe1   : > { %s472_s14 = scalar_lea.sflag (!%p3307_p8), [#allocation3], %s2987_s20  ;;  %s475_s16 = scalar_lea.vmem (!%p3307_p8), [#allocation2], %s2990_s12 }
  0xe7   : > { %2549 = dma.done.wait (%p3308_p3), %s472_s14, 256  }
  0xe8   : > { %2551 = vsyncadd (%p3308_p3), %s472_s14, 4294967040  ;;  %s480_s3 = sand.u32 1, %s2702_s23   ;;  %s484_s7 = scalar_lea.vmem [#allocation5], %s2990_s12 }
  0xe9   : > { %s481_s27 = scalar_lea.sflag [#allocation6], %s480_s3 }
  0xea   : > { %2553 = dma.done.wait (%p3308_p3), %s481_s27, 512  }
  0xeb   : > { %2555 = vsyncadd (%p3308_p3), %s481_s27, 4294966784  ;;  %s493_s11 = scalar_lea.vmem [#allocation7], %s2990_s12  ;;  %p3309_p11 = scmp.eq.s32.totalorder %s2702_s23, 0 }
  0xed   : > { %2557 = dma.done.wait (%p3309_p11), [#allocation9], 2048   ;;  %p3310_p2 = pmov %p3309_p11 }
  0xef   : > { %2559 = vsyncadd (%p3310_p2), [#allocation9], 4294965248  ;;  %p3311_p10 = pmov %p3310_p2 }
  0xf0   : > { %p3312_p5 = pmov %p3310_p2 }
  0xf1   : > { %2561 = dma.done.wait (%p3311_p10), [#allocation12], 2048  }
  0xf2   : > { %2563 = vsyncadd (%p3312_p5), [#allocation12], 4294965248  ;;  %v2603_v0 = vmov 0.0   ;;  %vm2604_vm0 = vmmov 0   ;;  %v2230_v1 = vld [vmem:[#allocation10] sm:$0xff]   ;;  %v2232_v3 = vld [vmem:[#allocation10 + $0x8] sm:$0xff]   ;;  %v588_v23 = vlaneseq }
  0xf3   : > { %1986 = vmatprep.subr.bf16.mxu1 %v2603_v0  ;;  %1966 = vmatprep.subr.bf16.mxu0 %v2603_v0  ;;  %v2231_v2 = vld [vmem:[#allocation8] sm:$0xff]   ;;  %v2233_v4 = vld [vmem:[#allocation8 + $0x8] sm:$0xff]   ;;  %v2234_v5 = vld [vmem:[#allocation10 + $0x10] sm:$0xff]   ;;  %s3313_s21 = sld [smem:[#allocation30_spill]]  ;;  %s3314_s10 = sld [smem:[#allocation31_spill]]  ;;  %vm908_vm1 = vcmask 261120  }
  0xf4   : > { %2002 = vmatprep.mubr.msk.bf16.mxu1 %vm2604_vm0, %v2603_v0  ;;  %1982 = vmatprep.mubr.msk.bf16.mxu0 %vm2604_vm0, %v2603_v0  ;;  %v2235_v6 = vld [vmem:[#allocation8 + $0x10] sm:$0xff]   ;;  %v2236_v7 = vld [vmem:[#allocation10 + $0x18] sm:$0xff]   ;;  %v2238_v9 = vld [vmem:[#allocation10 + $0x20] sm:$0xff]   ;;  %v589_v24 = vshrl.u32 %v588_v23, 7  ;;  %vm956_vm2 = vcmask 130048   ;;  %s2605_s17 = smov 96  }
  0xf5   : > { %1987 = vmatpush3.bf16.msra.mxu1 %v2230_v1  ;;  %1967 = vmatpush3.bf16.msra.mxu0 %v2231_v2  ;;  %v2237_v8 = vld [vmem:[#allocation8 + $0x18] sm:$0xff]   ;;  %v2239_v10 = vld [vmem:[#allocation8 + $0x20] sm:$0xff]   ;;  %v2240_v11 = vld [vmem:[#allocation10 + $0x28] sm:$0xff]   ;;  %s3315_s4 = sld [smem:[#allocation33_spill]]  ;;  %s2606_s15 = smov 64  }
  0xf6   : > { %1988 = vmatprep.subr.bf16.mxu1 %v2603_v0  ;;  %1968 = vmatprep.subr.bf16.mxu0 %v2603_v0  ;;  %v2241_v12 = vld [vmem:[#allocation8 + $0x28] sm:$0xff]   ;;  %v2242_v13 = vld [vmem:[#allocation10 + $0x30] sm:$0xff]   ;;  %v2244_v15 = vld [vmem:[#allocation10 + $0x38] sm:$0xff]   ;;  %v3053_v28 = vsub.s32 0, %v589_v24  ;;  %s2607_s6 = smov 32   ;;  %s3316_s26 = sld [smem:[#allocation21_spill]] }
  0xf7   : > { %v2243_v14 = vld [vmem:[#allocation8 + $0x30] sm:$0xff]   ;;  %v565_v17 = vld [vmem:[%s484_s7 + $0x8] sm:$0xff]  ;;  %v2246_v49 = vld [vmem:[#allocation11] sm:$0xff]   ;;  %s3317_s29 = sld [smem:[#allocation34_spill]]  ;;  %s557_s8 = scalar_lea.vmem [#allocation14], %s2990_s12 }
  0xf8   : > { %v564_v16 = vld [vmem:[%s484_s7] sm:$0xff]  ;;  %v2245_v18 = vld [vmem:[#allocation8 + $0x38] sm:$0xff]   ;;  %v2247_v50 = vld [vmem:[#allocation11 + $0x8] sm:$0xff]   ;;  %s1664_s14 = sshll.u32 %s557_s8, 4  ;;  %s1649_s12 = scalar_lea.sflag [#allocation4], %s2987_s20  ;;  %s3180_s14 = int_to_ptr.vmem [resolvable:$true] %s1664_s14 }
  0xf9   : > { %1989 = vmatpush3.bf16.msra.mxu1 %v2232_v3  ;;  %1969 = vmatpush3.bf16.msra.mxu0 %v2233_v4  ;;  %v561_v19 = vld [vmem:[%s475_s16] sm:$0xff]  ;;  %v562_v20 = vld [vmem:[%s475_s16 + $0x8] sm:$0xff]  ;;  %v566_v21 = vpack.c.bf16 %v565_v17, %v564_v16  ;;  %s3318_s16 = sld [smem:[#allocation26_spill]]  ;;  %s2496_s25 = scalar_lea.vmem %s3180_s14, 256 }
  0xfa   : > { %1990 = vmatprep.subr.bf16.mxu1 %v2603_v0  ;;  %1970 = vmatprep.subr.bf16.mxu0 %v2603_v0  ;;  %v563_v22 = vpack.c.bf16 %v562_v20, %v561_v19  ;;  %v586_v25 = vld [vmem:[%s3313_s21] sm:$0x1]  ;;  %v2248_v51 = vld [vmem:[#allocation11 + $0x10] sm:$0xff]   ;;  %v2249_v52 = vld [vmem:[#allocation11 + $0x18] sm:$0xff]   ;;  %p2497_p7 = scmp.ne.s32.totalorder %s3180_s14, %s2496_s25  ;;  %s2608_s21 = smov [#allocation14]  }
  0xfb   : > { %v697_v26 = vld [vmem:[%s3314_s10] sm:$0x1]  ;;  %v587_v27 = vunpack.c.l.bf16 %v586_v25  ;;  %v2251_v54 = vld [vmem:[#allocation11 + $0x28] sm:$0xff]   ;;  %v2252_v55 = vld [vmem:[#allocation11 + $0x30] sm:$0xff]   ;;  %s2500_s30 = sshll.u32 %s2608_s21, 4  ;;  %s2501_s30 = int_to_ptr.vmem [resolvable:$false] %s2500_s30 }
  0xfc   : > { %v698_v29 = vunpack.c.l.bf16 %v697_v26  ;;  %v2250_v53 = vld [vmem:[#allocation11 + $0x20] sm:$0xff]   ;;  %v2253_v56 = vld [vmem:[#allocation11 + $0x38] sm:$0xff]   ;;  %s1910_s3 = sshll.u32 %s3316_s26, 8  ;;  %s2502_s24 = scalar_lea.vmem %s2501_s30, 512 }
  0xfd   : > { %1991 = vmatpush3.bf16.msra.mxu1 %v2234_v5  ;;  %1971 = vmatpush3.bf16.msra.mxu0 %v2235_v6  ;;  %v591_v30 = vrot.slane %v587_v27, %v3053_v28  ;;  %v567_v57 = vld [vmem:[%s493_s11] sm:$0xff]  ;;  %v568_v58 = vld [vmem:[%s493_s11 + $0x8] sm:$0xff]  ;;  %s3319_s11 = sld [smem:[#allocation35_spill]]  ;;  %p2503_p13 = scmp.lt.s32.totalorder %s3180_s14, %s2501_s30 }
  0xfe   : > { %1992 = vmatprep.subr.bf16.mxu1 %v2603_v0  ;;  %1972 = vmatprep.subr.bf16.mxu0 %v2603_v0  ;;  %v702_v31 = vrot.slane %v698_v29, %v3053_v28  ;;  %v569_v59 = vpack.c.bf16 %v568_v58, %v567_v57  ;;  %v2256_v57 = vld [vmem:[#allocation13 + $0x10] sm:$0xff]   ;;  %v2257_v58 = vld [vmem:[#allocation13 + $0x18] sm:$0xff]   ;;  %p2504_p12 = scmp.lt.s32.totalorder %s2502_s24, %s2496_s25 }
  0xff   : > { %p3320_p6 = scmp.ne.s32.totalorder %s3318_s16, 0 }
 0x100   : > { %p2505_p9 = por %p2504_p12, %p2503_p13 }
 0x101   : > { %1993 = vmatpush3.bf16.msra.mxu1 %v2236_v7  ;;  %1973 = vmatpush3.bf16.msra.mxu0 %v2237_v8  ;;  %p2498_p4 = pnand %p2497_p7, %p3320_p6 }
 0x102   : > { %1994 = vmatprep.subr.bf16.mxu1 %v2603_v0  ;;  %1974 = vmatprep.subr.bf16.mxu0 %v2603_v0 }
 0x103   : > { %s3185_s23 = scalar_lea.hbm %s3319_s11, %s1910_s3  ;;  %p2499_p1 = pneg %p2498_p4 }
 0x105   : > { %1995 = vmatpush3.bf16.msra.mxu1 %v2238_v9  ;;  %1975 = vmatpush3.bf16.msra.mxu0 %v2239_v10  ;;  %p2506_p0 = pnand %p2505_p9, %p2499_p1 }
 0x106   : > { %1996 = vmatprep.subr.bf16.mxu1 %v2603_v0  ;;  %1976 = vmatprep.subr.bf16.mxu0 %v2603_v0 }
 0x109   : > { %1997 = vmatpush3.bf16.msra.mxu1 %v2240_v11  ;;  %1977 = vmatpush3.bf16.msra.mxu0 %v2241_v12 }
 0x10a   : > { %1998 = vmatprep.subr.bf16.mxu1 %v2603_v0  ;;  %1978 = vmatprep.subr.bf16.mxu0 %v2603_v0 }
 0x10d   : > { %1999 = vmatpush3.bf16.msra.mxu1 %v2242_v13  ;;  %1979 = vmatpush3.bf16.msra.mxu0 %v2243_v14  ;;  %v808_v13 = vld [vmem:[%s3315_s4] sm:$0x1] }
 0x10e   : > { %2000 = vmatprep.subr.bf16.mxu1 %v2603_v0  ;;  %1980 = vmatprep.subr.bf16.mxu0 %v2603_v0  ;;  %v809_v14 = vunpack.c.l.bf16 %v808_v13 }
 0x110   : > { %v813_v17 = vrot.slane %v809_v14, %v3053_v28 }
 0x111   : > { %2001 = vmatpush3.bf16.msra.mxu1 %v2244_v15  ;;  %1981 = vmatpush3.bf16.msra.mxu0 %v2245_v18 }
 0x112   : > { %2026 = vmatprep.subr.bf16.mxu1 %v2603_v0  ;;  %2006 = vmatprep.subr.bf16.mxu0 %v2603_v0 }
 0x114   : > { %2003 = vmatmul.mubr.bf16.vlgmr.msra.gmra.mrb[0].mxu1 %v566_v21  ;;  %1983 = vmatmul.mubr.bf16.vlgmr.msra.gmra.mrb[0].mxu0 %v563_v22 }
 0x115   : > { %2028 = vmatprep.mubr.msk.bf16.mxu1 %vm2604_vm0, %v2603_v0  ;;  %2022 = vmatprep.mubr.msk.bf16.mxu0 %vm2604_vm0, %v2603_v0 }
 0x116   : > { %2007 = vmatpush3.bf16.msra.mxu0 %v2246_v49 }
 0x117   : > { %2008 = vmatprep.subr.bf16.mxu0 %v2603_v0 }
 0x11a   : > { %2009 = vmatpush3.bf16.msra.mxu0 %v2247_v50 }
 0x11b   : > { %2010 = vmatprep.subr.bf16.mxu0 %v2603_v0 }
 0x11e   : > { %2011 = vmatpush3.bf16.msra.mxu0 %v2248_v51 }
 0x11f   : > { %2012 = vmatprep.subr.bf16.mxu0 %v2603_v0 }
 0x122   : > { %2013 = vmatpush3.bf16.msra.mxu0 %v2249_v52 }
 0x123   : > { %2014 = vmatprep.subr.bf16.mxu0 %v2603_v0 }
 0x126   : > { %2015 = vmatpush3.bf16.msra.mxu0 %v2250_v53 }
 0x127   : > { %2016 = vmatprep.subr.bf16.mxu0 %v2603_v0 }
 0x12a   : > { %2017 = vmatpush3.bf16.msra.mxu0 %v2251_v54 }
 0x12b   : > { %2018 = vmatprep.subr.bf16.mxu0 %v2603_v0 }
 0x12e   : > { %2019 = vmatpush3.bf16.msra.mxu0 %v2252_v55 }
 0x12f   : > { %2020 = vmatprep.subr.bf16.mxu0 %v2603_v0 }
 0x132   : > { %2021 = vmatpush3.bf16.msra.mxu0 %v2253_v56 }
 0x133   : > { %2050 = vmatprep.subr.bf16.mxu0 %v2603_v0 }
 0x135   : > { %2023 = vmatmul.mubr.bf16.vlgmr.msra.gmra.mrb[4].mxu0 %v569_v59 }
 0x136   : > { %2054 = vmatprep.mubr.msk.bf16.mxu0 %vm2604_vm0, %v2603_v0  ;;  %2051 = vmatpush3.bf16.msra.mxu0 %v2256_v57 }
 0x137   : > { %2052 = vmatprep.subr.bf16.mxu0 %v2603_v0 }
 0x13a   : > { %2053 = vmatpush3.bf16.msra.mxu0 %v2257_v58 }
 0x13b   : > { %2066 = vmatprep.subr.bf16.mxu0 %v2603_v0 }
 0x1e7   : > { %v785_v32 = vpop.f32.mrb[0].mxu1  ;;  %v674_v34 = vpop.f32.mrb[0].mxu0 }
 0x1e8   : > { %v2004_v33 = vpop.f32.mrb[1].mxu1  ;;  %v675_v36 = vadd.f32 %v674_v34, %v591_v30  ;;  %v1984_v37 = vpop.f32.mrb[1].mxu0  ;;  %v786_v38 = vadd.f32 %v785_v32, %v702_v31 }
 0x1e9   : > { %v788_v35 = vpop.f32.mrb[2].mxu1  ;;  %v677_v41 = vpop.f32.mrb[2].mxu0 }
 0x1ea   : > { %v789_v39 = vadd.f32 %v788_v35, %v702_v31  ;;  %v2005_v40 = vpop.f32.mrb[3].mxu1  ;;  %v903_v42 = vmul.f32 0.17677669, %v675_v36  ;;  %v678_v43 = vadd.f32 %v677_v41, %v591_v30  ;;  %v1985_v44 = vpop.f32.mrb[3].mxu0 }
 0x1ec   : > { %v3057_v45 = vpack.c.bf16 %v789_v39, %v786_v38  ;;  %v904_v46 = vmul.f32 0.17677669, %v678_v43 }
 0x1ee   : > { %v913_v47 = vsel %vm908_vm1, %v3057_v45, 0  ;;  %v3061_v48 = vpack.c.bf16 %v904_v46, %v903_v42 }
 0x1ef   : > { %2027 = vmatpush3.bf16.xpose.msra.mxu1 %v913_v47 }
 0x1f0   : > { %2032 = vmatprep.subr.bf16.mxu1 %v2603_v0 }
 0x1f6   : > { %2029 = vmatmul.mubr.msk.bf16.vlgmr.msra.gmra.mrb[4].mxu1 %vm908_vm1, %v3061_v48 }
 0x1f7   : > { %2034 = vmatprep.mubr.msk.bf16.mxu1 %vm2604_vm0, %v2603_v0 }
 0x208   : > { %v896_v15 = vpop.f32.mrb[4].mxu0 }
 0x209   : > { %v2024_v16 = vpop.f32.mrb[5].mxu0  ;;  %v897_v20 = vadd.f32 %v896_v15, %v813_v17 }
 0x20a   : > { %v899_v18 = vpop.f32.mrb[6].mxu0 }
 0x20b   : > { %v2025_v19 = vpop.f32.mrb[7].mxu0  ;;  %v900_v21 = vadd.f32 %v899_v18, %v813_v17 }
 0x20d   : > { %v3094_v22 = vpack.c.bf16 %v900_v21, %v897_v20 }
 0x20f   : > { %2033 = vmatpush3.bf16.msra.mxu1 %v3094_v22 }
 0x210   : > { %2038 = vmatprep.subr.bf16.mxu1 %v2603_v0 }
 0x2c9   : > { %v949_v60 = vpop.f32.mrb[4].mxu1 }
 0x2ca   : > { %v2030_v61 = vpop.f32.mrb[5].mxu1  ;;  %v957_v62 = vsel %vm956_vm2, %v949_v60, -inf }
 0x2cb   : > { %958 = vmax.xlane.f32.xlu0 %v957_v62  ;;  %v952_v63 = vpop.f32.mrb[6].mxu1 }
 0x2cc   : > { %v2031_v1 = vpop.f32.mrb[7].mxu1  ;;  %v960_v2 = vsel %vm956_vm2, %v952_v63, -inf }
 0x2cf   : > { %961 = vmax.xlane.f32.xlu0 %v960_v2 }
 0x2e5   : > { %1033 = vrot.lane.b32.xlu0 %v3057_v45, %s2605_s17 }
 0x358   : > { %v959_v3 = vpop.xlane.xlu0 %958 }
 0x359   : > { %v963_v4 = vsub.f32 %v949_v60, %v959_v3  ;;  %v2254_v3 = vld [vmem:[#allocation13] sm:$0xff]  }
 0x35b   : > { %v965_v5 = vmul.f32 1.442695, %v963_v4 }
 0x35c   : > { %v962_v6 = vpop.xlane.xlu0 %961 }
 0x35d   : > { %2262 = vpow2.f32 %v965_v5  ;;  %v964_v7 = vsub.f32 %v952_v63, %v962_v6  ;;  %v2255_v5 = vld [vmem:[#allocation13 + $0x8] sm:$0xff]  }
 0x35f   : > { %v967_v8 = vmul.f32 1.442695, %v964_v7 }
 0x360   : > { %v1034_v30 = vpop.permute.xlu0 %1033 }
 0x361   : > { %2264 = vpow2.f32 %v967_v8  ;;  %v1039_v32 = vsel %vm908_vm1, %v1034_v30, 0 }
 0x367   : > { %v2263_v9 = vpop.eup %2262 }
 0x368   : > { %v969_v10 = vsel %vm956_vm2, %v2263_v9, 0.0 }
 0x369   : > { %970 = vadd.xlane.f32.xlu1 %v969_v10 }
 0x36b   : > { %v2265_v11 = vpop.eup %2264 }
 0x36c   : > { %v972_v12 = vsel %vm956_vm2, %v2265_v11, 0.0 }
 0x36d   : > { %973 = vadd.xlane.f32.xlu1 %v972_v12 }
 0x37e   : > { %1030 = vrot.lane.b32.xlu1 %v3061_v48, %s2605_s17 }
 0x3f6   : > { %v971_v23 = vpop.xlane.xlu1 %970 }
 0x3f7   : > { %2266 = vrcp.f32 %v971_v23 }
 0x3fa   : > { %v974_v24 = vpop.xlane.xlu1 %973 }
 0x3fb   : > { %2268 = vrcp.f32 %v974_v24 }
 0x3fe   : > { %v1031_v33 = vpop.permute.xlu1 %1030 }
 0x401   : > { %v2267_v25 = vpop.eup %2266 }
 0x402   : > { %v977_v27 = vmul.f32 %v2267_v25, %v2263_v9 }
 0x405   : > { %v2269_v26 = vpop.eup %2268 }
 0x406   : > { %v978_v29 = vmul.f32 %v2269_v26, %v2265_v11 }
 0x408   : > { %v979_v31 = vpack.c.bf16 %v978_v29, %v977_v27 }
 0x40a   : > { %2035 = vmatmul.mubr.msk.bf16.vlgmr.msra.gmra.mrb[8].mxu1 %vm956_vm2, %v979_v31 }
 0x40b   : > { %2039 = vmatpush3.bf16.xpose.msra.mxu1 %v1039_v32  ;;  %2040 = vmatprep.mubr.msk.bf16.mxu1 %vm2604_vm0, %v2603_v0 }
 0x40c   : > { %2044 = vmatprep.subr.bf16.mxu1 %v2603_v0 }
 0x412   : > { %2041 = vmatmul.mubr.msk.bf16.vlgmr.msra.gmra.mrb[12].mxu1 %vm908_vm1, %v1031_v33 }
 0x413   : > { %2046 = vmatprep.mubr.msk.bf16.mxu1 %vm2604_vm0, %v2603_v0 }
 0x4dd   : > { %v1017_v34 = vpop.f32.mrb[8].mxu1 }
 0x4de   : > { %v2036_v35 = vpop.f32.mrb[9].mxu1 }
 0x4df   : > { %v1020_v36 = vpop.f32.mrb[10].mxu1 }
 0x4e0   : > { %v1024_v37 = vpack.c.bf16 %v1020_v36, %v1017_v34  ;;  %v2037_v38 = vpop.f32.mrb[11].mxu1 }
 0x4e5   : > { %v1075_v39 = vpop.f32.mrb[12].mxu1 }
 0x4e6   : > { %v2042_v40 = vpop.f32.mrb[13].mxu1  ;;  %v1082_v41 = vsel %vm956_vm2, %v1075_v39, -inf }
 0x4e7   : > { %1083 = vmax.xlane.f32.xlu1 %v1082_v41  ;;  %v1078_v42 = vpop.f32.mrb[14].mxu1 }
 0x4e8   : > { %v2043_v43 = vpop.f32.mrb[15].mxu1  ;;  %v1085_v44 = vsel %vm956_vm2, %v1078_v42, -inf }
 0x4e9   : > { %1086 = vmax.xlane.f32.xlu0 %v1085_v44 }
 0x574   : > { %v1084_v46 = vpop.xlane.xlu1 %1083 }
 0x575   : > { %v1088_v47 = vsub.f32 %v1075_v39, %v1084_v46 }
 0x576   : > { %v1087_v49 = vpop.xlane.xlu0 %1086 }
 0x577   : > { %v1090_v50 = vmul.f32 1.442695, %v1088_v47  ;;  %v1089_v51 = vsub.f32 %v1078_v42, %v1087_v49 }
 0x579   : > { %2270 = vpow2.f32 %v1090_v50  ;;  %v1092_v52 = vmul.f32 1.442695, %v1089_v51 }
 0x57b   : > { %2272 = vpow2.f32 %v1092_v52 }
 0x583   : > { %v2271_v53 = vpop.eup %2270 }
 0x584   : > { %v1094_v54 = vsel %vm956_vm2, %v2271_v53, 0.0 }
 0x585   : > { %v2273_v55 = vpop.eup %2272  ;;  %1095 = vadd.xlane.f32.xlu0 %v1094_v54  ;;  %v2259_v54 = vld [vmem:[#allocation13 + $0x28] sm:$0xff]  }
 0x586   : > { %v1097_v56 = vsel %vm956_vm2, %v2273_v55, 0.0 }
 0x587   : > { %1098 = vadd.xlane.f32.xlu1 %v1097_v56 }
 0x598   : > { %1272 = vrot.lane.b32.xlu1 %v3057_v45, %s2606_s15 }
 0x59b   : > { %1106 = vrot.lane.b32.xlu0 %v3094_v22, %s2605_s17 }
 0x59c   : > { %1270 = vrot.lane.b32.xlu1 %v3061_v48, %s2606_s15 }
 0x612   : > { %v1096_v59 = vpop.xlane.xlu0 %1095 }
 0x613   : > { %2274 = vrcp.f32 %v1096_v59 }
 0x614   : > { %v1099_v60 = vpop.xlane.xlu1 %1098 }
 0x615   : > { %2276 = vrcp.f32 %v1099_v60 }
 0x616   : > { %v1107_v61 = vpop.permute.xlu0 %1106 }
 0x617   : > { %2045 = vmatpush3.bf16.msra.mxu1 %v1107_v61 }
 0x618   : > { %2058 = vmatprep.subr.bf16.mxu1 %v2603_v0  ;;  %v1273_v8 = vpop.permute.xlu1 %1272 }
 0x619   : > { %v1278_v12 = vsel %vm908_vm1, %v1273_v8, 0 }
 0x61c   : > { %v1271_v17 = vpop.permute.xlu1 %1270 }
 0x61d   : > { %v2275_v62 = vpop.eup %2274 }
 0x61e   : > { %v1102_v1 = vmul.f32 %v2275_v62, %v2271_v53 }
 0x61f   : > { %v2277_v63 = vpop.eup %2276 }
 0x620   : > { %v1103_v2 = vmul.f32 %v2277_v63, %v2273_v55 }
 0x622   : > { %v1104_v4 = vpack.c.bf16 %v1103_v2, %v1102_v1 }
 0x624   : > { %2047 = vmatmul.mubr.msk.bf16.vlgmr.msra.gmra.mrb[16].mxu1 %vm956_vm2, %v1104_v4 }
 0x625   : > { %2059 = vmatpush3.bf16.msra.mxu1 %v2254_v3  ;;  %2062 = vmatprep.mubr.msk.bf16.mxu1 %vm2604_vm0, %v2603_v0 }
 0x626   : > { %2060 = vmatprep.subr.bf16.mxu1 %v2603_v0 }
 0x629   : > { %2061 = vmatpush3.bf16.msra.mxu1 %v2255_v5 }
 0x62a   : > { %2072 = vmatprep.subr.bf16.mxu1 %v2603_v0 }
 0x62c   : > { %2063 = vmatmul.mubr.msk.bf16.vlgmr.msra.gmra.mrb[20].mxu1 %vm908_vm1, %v1024_v37 }
 0x62d   : > { %2074 = vmatprep.mubr.msk.bf16.mxu1 %vm2604_vm0, %v2603_v0 }
 0x6f7   : > { %v1146_v6 = vpop.f32.mrb[16].mxu1 }
 0x6f8   : > { %v2048_v7 = vpop.f32.mrb[17].mxu1 }
 0x6f9   : > { %v1149_v9 = vpop.f32.mrb[18].mxu1 }
 0x6fa   : > { %v1153_v10 = vpack.c.bf16 %v1149_v9, %v1146_v6  ;;  %v2049_v11 = vpop.f32.mrb[19].mxu1 }
 0x6fc   : > { %2055 = vmatmul.mubr.msk.bf16.vlgmr.msra.gmra.mrb[8].mxu0 %vm908_vm1, %v1153_v10 }
 0x6fd   : > { %2067 = vmatpush3.bf16.xpose.msra.mxu0 %v1278_v12  ;;  %2068 = vmatprep.mubr.msk.bf16.mxu0 %vm2604_vm0, %v2603_v0 }
 0x6fe   : > { %2078 = vmatprep.subr.bf16.mxu0 %v2603_v0 }
 0x6ff   : > { %v1263_v13 = vpop.f32.mrb[20].mxu1 }
 0x700   : > { %v2064_v14 = vpop.f32.mrb[21].mxu1 }
 0x701   : > { %v1266_v15 = vpop.f32.mrb[22].mxu1 }
 0x702   : > { %v2065_v16 = vpop.f32.mrb[23].mxu1 }
 0x704   : > { %2069 = vmatmul.mubr.msk.bf16.vlgmr.msra.gmra.mrb[12].mxu0 %vm908_vm1, %v1271_v17 }
 0x705   : > { %2082 = vmatprep.mubr.msk.bf16.mxu0 %vm2604_vm0, %v2603_v0 }
 0x7cf   : > { %v1207_v18 = vpop.f32.mrb[8].mxu0 }
 0x7d0   : > { %v3135_v19 = vadd.f32 %v1263_v13, %v1207_v18  ;;  %v2056_v20 = vpop.f32.mrb[9].mxu0  ;;  %v2260_v13 = vld [vmem:[#allocation13 + $0x30] sm:$0xff]  }
 0x7d1   : > { %v1210_v21 = vpop.f32.mrb[10].mxu0 }
 0x7d2   : > { %v3137_v23 = vadd.f32 %v1266_v15, %v1210_v21  ;;  %v2057_v24 = vpop.f32.mrb[11].mxu0 }
 0x7d7   : > { %v1314_v25 = vpop.f32.mrb[12].mxu0 }
 0x7d8   : > { %v2070_v26 = vpop.f32.mrb[13].mxu0  ;;  %v1321_v27 = vsel %vm956_vm2, %v1314_v25, -inf }
 0x7d9   : > { %1322 = vmax.xlane.f32.xlu1 %v1321_v27  ;;  %v1317_v29 = vpop.f32.mrb[14].mxu0 }
 0x7da   : > { %v2071_v30 = vpop.f32.mrb[15].mxu0  ;;  %v1324_v31 = vsel %vm956_vm2, %v1317_v29, -inf }
 0x7db   : > { %1325 = vmax.xlane.f32.xlu0 %v1324_v31 }
 0x7ea   : > { %1344 = vrot.lane.b32.xlu1 %v3094_v22, %s2606_s15 }
 0x7ee   : > { %1454 = vrot.lane.b32.xlu1 %v3061_v48, %s2607_s6  ;;  %v2258_v48 = vld [vmem:[#allocation13 + $0x20] sm:$0xff]  }
 0x7ef   : > { %2079 = vmatpush3.bf16.msra.mxu0 %v2258_v48 }
 0x7f0   : > { %2080 = vmatprep.subr.bf16.mxu0 %v2603_v0 }
 0x7f3   : > { %2081 = vmatpush3.bf16.msra.mxu0 %v2259_v54 }
 0x7f4   : > { %2092 = vmatprep.subr.bf16.mxu0 %v2603_v0 }
 0x866   : > { %v1323_v32 = vpop.xlane.xlu1 %1322 }
 0x867   : > { %v1327_v33 = vsub.f32 %v1314_v25, %v1323_v32 }
 0x868   : > { %v1326_v34 = vpop.xlane.xlu0 %1325 }
 0x869   : > { %v1329_v35 = vmul.f32 1.442695, %v1327_v33  ;;  %v1328_v36 = vsub.f32 %v1317_v29, %v1326_v34  ;;  %v1638_v34 = vld [vmem:[%s3317_s29] sm:$0x1] }
 0x86a   : > { %v1345_v37 = vpop.permute.xlu1 %1344 }
 0x86b   : > { %2278 = vpow2.f32 %v1329_v35  ;;  %v1331_v38 = vmul.f32 1.442695, %v1328_v36  ;;  %2073 = vmatpush3.bf16.msra.mxu1 %v1345_v37  ;;  %v1639_v35 = vunpack.c.l.bf16 %v1638_v34 }
 0x86c   : > { %2086 = vmatprep.subr.bf16.mxu1 %v2603_v0 }
 0x86d   : > { %2280 = vpow2.f32 %v1331_v38  ;;  %v1643_v36 = vrot.slane %v1639_v35, %v3053_v28 }
 0x875   : > { %v2279_v39 = vpop.eup %2278 }
 0x876   : > { %v1333_v40 = vsel %vm956_vm2, %v2279_v39, 0.0 }
 0x877   : > { %v2281_v41 = vpop.eup %2280  ;;  %1334 = vadd.xlane.f32.xlu0 %v1333_v40 }
 0x878   : > { %v1336_v42 = vsel %vm956_vm2, %v2281_v41, 0.0 }
 0x87b   : > { %1337 = vadd.xlane.f32.xlu0 %v1336_v42 }
 0x891   : > { %1456 = vrot.lane.b32.xlu0 %v3057_v45, %s2607_s6  ;;  %v1455_v45 = vpop.permute.xlu1 %1454 }
 0x904   : > { %v1335_v43 = vpop.xlane.xlu0 %1334 }
 0x905   : > { %2282 = vrcp.f32 %v1335_v43 }
 0x908   : > { %v1338_v44 = vpop.xlane.xlu0 %1337 }
 0x909   : > { %2284 = vrcp.f32 %v1338_v44 }
 0x90c   : > { %v1457_v51 = vpop.permute.xlu0 %1456 }
 0x90d   : > { %v1462_v53 = vsel %vm908_vm1, %v1457_v51, 0 }
 0x90f   : > { %v2283_v46 = vpop.eup %2282 }
 0x910   : > { %v1341_v49 = vmul.f32 %v2283_v46, %v2279_v39 }
 0x913   : > { %v2285_v47 = vpop.eup %2284 }
 0x914   : > { %v1342_v50 = vmul.f32 %v2285_v47, %v2281_v41 }
 0x916   : > { %v1343_v52 = vpack.c.bf16 %v1342_v50, %v1341_v49 }
 0x918   : > { %2075 = vmatmul.mubr.msk.bf16.vlgmr.msra.gmra.mrb[24].mxu1 %vm956_vm2, %v1343_v52 }
 0x919   : > { %2087 = vmatpush3.bf16.xpose.msra.mxu1 %v1462_v53  ;;  %2088 = vmatprep.mubr.msk.bf16.mxu1 %vm2604_vm0, %v2603_v0 }
 0x91a   : > { %2098 = vmatprep.subr.bf16.mxu1 %v2603_v0 }
 0x920   : > { %2089 = vmatmul.mubr.msk.bf16.vlgmr.msra.gmra.mrb[28].mxu1 %vm908_vm1, %v1455_v45 }
 0x921   : > { %2102 = vmatprep.mubr.msk.bf16.mxu1 %vm2604_vm0, %v2603_v0  ;;  %2099 = vmatpush3.bf16.msra.mxu1 %v2260_v13 }
 0x922   : > { %2100 = vmatprep.subr.bf16.mxu1 %v2603_v0 }
 0x9eb   : > { %v1384_v55 = vpop.f32.mrb[24].mxu1 }
 0x9ec   : > { %v2076_v56 = vpop.f32.mrb[25].mxu1 }
 0x9ed   : > { %v1387_v57 = vpop.f32.mrb[26].mxu1 }
 0x9ee   : > { %v1391_v58 = vpack.c.bf16 %v1387_v57, %v1384_v55  ;;  %v2077_v59 = vpop.f32.mrb[27].mxu1 }
 0x9f0   : > { %2083 = vmatmul.mubr.msk.bf16.vlgmr.msra.gmra.mrb[16].mxu0 %vm908_vm1, %v1391_v58 }
 0x9f1   : > { %2094 = vmatprep.mubr.msk.bf16.mxu0 %vm2604_vm0, %v2603_v0 }
 0x9f3   : > { %v1498_v60 = vpop.f32.mrb[28].mxu1 }
 0x9f4   : > { %v2090_v61 = vpop.f32.mrb[29].mxu1  ;;  %v1505_v62 = vsel %vm956_vm2, %v1498_v60, -inf }
 0x9f5   : > { %1506 = vmax.xlane.f32.xlu1 %v1505_v62  ;;  %v1501_v63 = vpop.f32.mrb[30].mxu1 }
 0x9f6   : > { %v2091_v1 = vpop.f32.mrb[31].mxu1  ;;  %v1508_v2 = vsel %vm956_vm2, %v1501_v63, -inf }
 0x9f7   : > { %1509 = vmax.xlane.f32.xlu0 %v1508_v2 }
 0xa82   : > { %v1507_v3 = vpop.xlane.xlu1 %1506 }
 0xa83   : > { %v1511_v4 = vsub.f32 %v1498_v60, %v1507_v3 }
 0xa84   : > { %v1510_v5 = vpop.xlane.xlu0 %1509 }
 0xa85   : > { %v1513_v6 = vmul.f32 1.442695, %v1511_v4  ;;  %v1512_v7 = vsub.f32 %v1501_v63, %v1510_v5 }
 0xa87   : > { %2286 = vpow2.f32 %v1513_v6  ;;  %v1515_v8 = vmul.f32 1.442695, %v1512_v7 }
 0xa89   : > { %2288 = vpow2.f32 %v1515_v8 }
 0xa91   : > { %v2287_v9 = vpop.eup %2286 }
 0xa92   : > { %v1517_v10 = vsel %vm956_vm2, %v2287_v9, 0.0 }
 0xa93   : > { %v2289_v11 = vpop.eup %2288  ;;  %1518 = vadd.xlane.f32.xlu0 %v1517_v10 }
 0xa94   : > { %v1520_v12 = vsel %vm956_vm2, %v2289_v11, 0.0 }
 0xa95   : > { %1521 = vadd.xlane.f32.xlu1 %v1520_v12 }
 0xaa9   : > { %1528 = vrot.lane.b32.xlu0 %v3094_v22, %s2607_s6 }
 0xac3   : > { %v1445_v14 = vpop.f32.mrb[16].mxu0 }
 0xac4   : > { %v1452_v15 = vadd.f32 %v1445_v14, %v3135_v19  ;;  %v2084_v16 = vpop.f32.mrb[17].mxu0  ;;  %v2261_v19 = vld [vmem:[#allocation13 + $0x38] sm:$0xff]  }
 0xac5   : > { %v1448_v17 = vpop.f32.mrb[18].mxu0  ;;  %2101 = vmatpush3.bf16.msra.mxu1 %v2261_v19 }
 0xac6   : > { %v1453_v18 = vadd.f32 %v1448_v17, %v3137_v23  ;;  %v2085_v20 = vpop.f32.mrb[19].mxu0 }
 0xb20   : > { %v1519_v21 = vpop.xlane.xlu0 %1518 }
 0xb21   : > { %2290 = vrcp.f32 %v1519_v21 }
 0xb22   : > { %v1522_v24 = vpop.xlane.xlu1 %1521 }
 0xb23   : > { %2292 = vrcp.f32 %v1522_v24 }
 0xb24   : > { %v1529_v25 = vpop.permute.xlu0 %1528 }
 0xb25   : > { %2093 = vmatpush3.bf16.msra.mxu0 %v1529_v25 }
 0xb2b   : > { %v2291_v26 = vpop.eup %2290 }
 0xb2c   : > { %v1525_v27 = vmul.f32 %v2291_v26, %v2287_v9 }
 0xb2d   : > { %v2293_v22 = vpop.eup %2292 }
 0xb2e   : > { %v1526_v29 = vmul.f32 %v2293_v22, %v2289_v11 }
 0xb30   : > { %v1527_v0 = vpack.c.bf16 %v1526_v29, %v1525_v27 }
 0xb32   : > { %2095 = vmatmul.mubr.msk.bf16.vlgmr.msra.gmra.mrb[20].mxu0 %vm956_vm2, %v1527_v0 }
 0xc05   : > { %v1568_v30 = vpop.f32.mrb[20].mxu0 }
 0xc06   : > { %v2096_v23 = vpop.f32.mrb[21].mxu0 }
 0xc07   : > { %v1571_v31 = vpop.f32.mrb[22].mxu0 }
 0xc08   : > { %v1575_v32 = vpack.c.bf16 %v1571_v31, %v1568_v30  ;;  %v2097_v33 = vpop.f32.mrb[23].mxu0 }
 0xc0a   : > { %2103 = vmatmul.mubr.msk.bf16.vlgmr.msra.gmra.mrb[32].mxu1 %vm908_vm1, %v1575_v32 }
 0xcdd   : > { %v1629_v37 = vpop.f32.mrb[32].mxu1 }
 0xcde   : > { %v1636_v38 = vadd.f32 %v1629_v37, %v1452_v15  ;;  %v2104_v39 = vpop.f32.mrb[33].mxu1 }
 0xcdf   : > { %v1632_v40 = vpop.f32.mrb[34].mxu1 }
 0xce0   : > { %v1644_v41 = vadd.f32 %v1643_v36, %v1636_v38  ;;  %v1637_v42 = vadd.f32 %v1632_v40, %v1453_v18  ;;  %v2105_v48 = vpop.f32.mrb[35].mxu1 }
 0xce2   : > { %1646 = vst [vmem:[%s557_s8] sm:$0xff] %v1644_v41  ;;  %v1645_v28 = vadd.f32 %v1643_v36, %v1637_v42 }
 0xce4   : > { %1647 = vst [vmem:[%s557_s8 + $0x8] sm:$0xff] %v1645_v28 }
 0xce5   : > { %2509 = shalt.err (!%p2506_p0)
}
 0xce6   : > { %s2510_s10 = scalar_lea.hbm %s3185_s23, 256  ;;  %s2514_s22 = scalar_lea.hbm %s3319_s11, 512 }
 0xce7   : > { %p2511_p8 = scmp.ne.s32.totalorder %s3185_s23, %s2510_s10  ;;  %p2515_p2 = scmp.lt.u32.totalorder %s3185_s23, %s3319_s11 }
 0xce8   : > { %p2516_p10 = scmp.lt.u32.totalorder %s2514_s22, %s2510_s10  ;;  %p2518_p7 = scmp.lt.u32.totalorder %s2510_s10, %s3185_s23 }
 0xce9   : > { %p2512_p3 = pnand %p2511_p8, %p3320_p6 }
 0xcea   : > { %p2517_p5 = por %p2516_p10, %p2515_p2 }
 0xceb   : > { %p2513_p11 = pneg %p2512_p3 }
 0xcec   : > { %p2519_p4 = por %p2518_p7, %p2517_p5 }
 0xcee   : > { %p2520_p1 = pnand %p2519_p4, %p2513_p11 }
 0xcf0   : > { %2523 = shalt.err (!%p2520_p1)
}
 0xcf1   : > { %s2609_s6 = smov 128   ;;  %s2610_s26 = smov 8  }
 0xcf2   : > { %2128 = dma.vmem_to_hbm [thread:$0]  (%p3320_p6), %s3180_s14, 256, %s3185_s23, %s1649_s12, %s2609_s6, %s2609_s6, %s2610_s26  }
 0xcf3 PF: > { %s3321_s13 = sld [smem:[#allocation20_spill]]  ;;  %s3322_s28 = sld [smem:[#allocation24_spill]] }
 0xcf4   : > { %s3323_s29 = sld [smem:[#allocation23_spill]] }
 0xcf9   : > { %s1679_s8 = sand.u32 1, %s3321_s13   ;;  %p3324_p13 = scmp.ne.s32.totalorder %s3322_s28, 0 }
 0xcfa   : > { %p3325_p12 = scmp.ge.s32.totalorder %s3323_s29, 2  ;;  %s1680_s3 = scalar_lea.sflag [#allocation4], %s1679_s8 }
 0xcfc   : > { %p2154_p9 = pnand %p3325_p12, %p3324_p13 }
 0xcfe   : > { %2565 = dma.done.wait (!%p2154_p9), %s1680_s3, 256  }
 0xcff   : > { %2567 = vsyncadd (!%p2154_p9), %s1680_s3, 4294967040  ;;  %s32_s22 = sadd.s32 1, %s3323_s29   ;;  %s3326_s27 = sld [smem:[#allocation27_spill]] }
 0xd00   : > { %p29_p0 = scmp.ge.s32.totalorder %s32_s22, 4   ;;  %s3327_s20 = sld [smem:[#allocation22_spill]] }
 0xd01   : > { %s3328_s21 = sld [smem:[#allocation25_spill]]  ;;  %s3329_s17 = smov %s2574_s18 }
 0xd02   : > { %s3330_s18 = smov %s2578_s19  ;;  %31 = sbr.rel (!%p29_p0) target bundleno = 19 (0x13), region = 149 }
 0xd05   : > { %s3331_s19 = smov %s3326_s27 }
 0xd09   :  { %1685 = vsyncpa [#allocation3], 1 }
 0xd0a   :  { %1687 = vsyncpa [#allocation3 + $0x1], 1 }
 0xd0b   :  { %1688 = vsyncpa [#allocation6], 1 }
 0xd0c   :  { %1690 = vsyncpa [#allocation6 + $0x1], 1 }
 0xd0d   :  { %1691 = vsyncpa [#allocation9], 1 }
 0xd0e   :  { %1692 = vsyncpa [#allocation12], 1 }
 0xd0f   :  { %1693 = vsyncpa [#allocation4], 1 }
 0xd10   :  { %1695 = vsyncpa [#allocation4 + $0x1], 1 }

</bundles_post_ra>
